<compile_context>
chip_gen: v5e
topology: v5e:2x2
jax: 0.10.0
libtpu: 0.0.40
codegen_flags: <defaults>
</compile_context>

<pallas_src>
import numpy as np
import jax
import jax.numpy as jnp
from jax import lax
from jax.experimental import pallas as pl
from jax.experimental.pallas import tpu as pltpu

EPS = 1e-5
# 48 MiB: above the default scoped limits on v5e/v6e/v7x, below v7x's 64 MiB
# physical VMEM.  Per-step tiles here are far smaller.
_VMEM_LIMIT = 48 * 1024 * 1024


def _silu(y):
    # exact SiLU; sigmoid(y) = 0.5*(tanh(y/2)+1) -> a single EUP op per element
    return y * (0.5 * (jnp.tanh(0.5 * y) + 1.0))


def _fold_bn(p):
    cout = p["w"].shape[0]
    inv_std = 1.0 / jnp.sqrt(p["rvar"] + EPS)
    scale = (p["gamma"] * inv_std).reshape(1, cout)
    bias = (p["beta"] - p["rmean"] * p["gamma"] * inv_std).reshape(1, cout)
    return scale, bias


def _row_tile(m, target=1024):
    return m if m <= target else target


def _pick_th(h, target=16):
    t = min(target, h)
    while t > 1 and h % t != 0:
        t -= 1
    return max(t, 1)


# --------------------------------------------------------------------------
# Kernel A: fused cv1 + cv2 (two 1x1 Conv+BN+SiLU sharing x) as ONE matmul
# per row tile against the lane-concatenated weight.
# --------------------------------------------------------------------------
def _dual_pw_kernel(x_ref, w_ref, s_ref, b_ref, y1_ref, y2_ref):
    c1o = y1_ref.shape[-1]
    y = jnp.dot(x_ref[...], w_ref[...], preferred_element_type=jnp.float32)
    y = _silu(y * s_ref[...] + b_ref[...])
    y1_ref[...] = y[:, :c1o].astype(y1_ref.dtype)
    y2_ref[...] = y[:, c1o:].astype(y2_ref.dtype)


def dual_conv1x1_bn_silu(x_nhwc, p1, p2, tm_target=1024):
    n, h, w, cin = x_nhwc.shape
    m = n * h * w
    c1o = p1["w"].shape[0]
    c2o = p2["w"].shape[0]
    x2d = x_nhwc.reshape(m, cin)
    w12 = jnp.concatenate([jnp.transpose(p1["w"][:, :, 0, 0]),
                           jnp.transpose(p2["w"][:, :, 0, 0])], axis=1)
    s1, b1 = _fold_bn(p1)
    s2, b2 = _fold_bn(p2)
    s12 = jnp.concatenate([s1, s2], axis=1)
    b12 = jnp.concatenate([b1, b2], axis=1)
    tm = _row_tile(m, tm_target)

    y1, y2 = pl.pallas_call(
        _dual_pw_kernel,
        out_shape=(jax.ShapeDtypeStruct((m, c1o), x_nhwc.dtype),
                   jax.ShapeDtypeStruct((m, c2o), x_nhwc.dtype)),
        grid=(pl.cdiv(m, tm),),
        in_specs=[
            pl.BlockSpec((tm, cin), lambda i: (i, 0)),
            pl.BlockSpec((cin, c1o + c2o), lambda i: (0, 0)),
            pl.BlockSpec((1, c1o + c2o), lambda i: (0, 0)),
            pl.BlockSpec((1, c1o + c2o), lambda i: (0, 0)),
        ],
        out_specs=(pl.BlockSpec((tm, c1o), lambda i: (i, 0)),
                   pl.BlockSpec((tm, c2o), lambda i: (i, 0))),
        compiler_params=pltpu.CompilerParams(
            dimension_semantics=("parallel",),
            vmem_limit_bytes=_VMEM_LIMIT),
    )(x2d, w12, s12, b12)
    return y1.reshape(n, h, w, c1o), y2.reshape(n, h, w, c2o)


# --------------------------------------------------------------------------
# Kernel B: fused Bottleneck (1x1 Conv+BN+SiLU -> 3x3 Conv+BN+SiLU -> + y1).
# Row-tiled; 1-row halos via clamped single-row BlockSpecs; 1x1 intermediate
# written straight into a (th+2, w, c) VMEM scratch (only the two halo rows
# are conditionally zeroed); 3x3 conv = row-channel-stacked matmuls with the
# width taps combined on the matmul outputs (zero column + slice).
# --------------------------------------------------------------------------
def _bottleneck_kernel(y1c_ref, y1t_ref, y1b_ref,
                       w1_ref, sc1_ref, bi1_ref,
                       w3_ref, sc3_ref, bi3_ref,
                       o_ref, z_ref):
    i = pl.program_id(1)
    n_row = pl.num_programs(1)
    _, th, w, c = y1c_ref.shape

    w1 = w1_ref[...]
    sc1 = sc1_ref[...]
    bi1 = bi1_ref[...]

    # ---- 1x1 conv + BN + SiLU, written directly into the row-extended scratch
    zc = jnp.dot(y1c_ref[...].reshape(th * w, c), w1,
                 preferred_element_type=jnp.float32)
    z_ref[1:th + 1] = _silu(zc * sc1 + bi1).reshape(th, w, c)

    zt = _silu(jnp.dot(y1t_ref[0, 0], w1,
                       preferred_element_type=jnp.float32) * sc1 + bi1)
    z_ref[0] = jnp.where(i == 0, 0.0, zt)                 # 3x3 zero pad at top
    zb = _silu(jnp.dot(y1b_ref[0, 0], w1,
                       preferred_element_type=jnp.float32) * sc1 + bi1)
    z_ref[th + 1] = jnp.where(i == n_row - 1, 0.0, zb)    # ... and at bottom

    # ---- 3x3 conv: s_dj[t, j] = sum_di z[t+di, j, :] @ W[di, dj, :, :] ----
    if c >= 128:
        # contraction depth already filled; skip the lane-axis concat and let
        # the MXU accumulate the three K=c height taps (v7x MRB accumulates
        # in place).
        taps = []
        for dj in range(3):
            acc = jnp.dot(z_ref[0:th].reshape(th * w, c),
                          w3_ref[dj, 0:c, :],
                          preferred_element_type=jnp.float32)
            for di in (1, 2):
                acc = acc + jnp.dot(z_ref[di:di + th].reshape(th * w, c),
                                    w3_ref[dj, di * c:(di + 1) * c, :],
                                    preferred_element_type=jnp.float32)
            taps.append(acc.reshape(th, w, c))
        s0, s1, s2 = taps
    else:
        x3 = jnp.concatenate(
            [z_ref[0:th], z_ref[1:th + 1], z_ref[2:th + 2]],
            axis=-1).reshape(th * w, 3 * c)
        s0 = jnp.dot(x3, w3_ref[0],
                     preferred_element_type=jnp.float32).reshape(th, w, c)
        s1 = jnp.dot(x3, w3_ref[1],
                     preferred_element_type=jnp.float32).reshape(th, w, c)
        s2 = jnp.dot(x3, w3_ref[2],
                     preferred_element_type=jnp.float32).reshape(th, w, c)

    # width taps combined on outputs: conv[:, j] = s0[:, j-1] + s1[:, j] + s2[:, j+1]
    # TODO(synk): pltpu.roll would realize these +-1 shifts on the XLU slot.
    zero_col = jnp.zeros((th, 1, c), jnp.float32)
    left = jnp.concatenate([zero_col, s0[:, :w - 1, :]], axis=1)
    right = jnp.concatenate([s2[:, 1:, :], zero_col], axis=1)
    conv = (left + s1 + right).reshape(th * w, c)

    y = _silu(conv * sc3_ref[...] + bi3_ref[...]).reshape(th, w, c)
    o_ref[...] = (y[None] + y1c_ref[...]).astype(o_ref.dtype)


def bottleneck_fused(y1_nhwc, bp, th_target=16):
    n, h, w, c = y1_nhwc.shape
    th = _pick_th(h, th_target)
    n_rows = h // th

    w1k = jnp.transpose(bp["cv1"]["w"][:, :, 0, 0])        # (c, c)
    s1f, b1f = _fold_bn(bp["cv1"])
    # torch (cout, cin, kh, kw) -> (kw=dj, kh*cin, cout): w3k[dj][di*c + ci, co]
    w_hwio = jnp.transpose(bp["cv2"]["w"], (2, 3, 1, 0))   # (kh, kw, cin, cout)
    w3k = jnp.transpose(w_hwio, (1, 0, 2, 3)).reshape(3, 3 * c, c)
    s3f, b3f = _fold_bn(bp["cv2"])

    out = pl.pallas_call(
        _bottleneck_kernel,
        out_shape=jax.ShapeDtypeStruct((n, h, w, c), y1_nhwc.dtype),
        grid=(n, n_rows),
        in_specs=[
            # center tile (also the residual)
            pl.BlockSpec((1, th, w, c), lambda b, i: (b, i, 0, 0)),
            # 1-row top/bottom halos, clamped at the image borders
            pl.BlockSpec((1, 1, w, c),
                         lambda b, i: (b, jnp.maximum(i * th - 1, 0), 0, 0)),
            pl.BlockSpec((1, 1, w, c),
                         lambda b, i: (b, jnp.minimum(i * th + th, h - 1), 0, 0)),
            pl.BlockSpec((c, c), lambda b, i: (0, 0)),
            pl.BlockSpec((1, c), lambda b, i: (0, 0)),
            pl.BlockSpec((1, c), lambda b, i: (0, 0)),
            pl.BlockSpec((3, 3 * c, c), lambda b, i: (0, 0, 0)),
            pl.BlockSpec((1, c), lambda b, i: (0, 0)),
            pl.BlockSpec((1, c), lambda b, i: (0, 0)),
        ],
        out_specs=pl.BlockSpec((1, th, w, c), lambda b, i: (b, i, 0, 0)),
        scratch_shapes=[pltpu.VMEM((th + 2, w, c), jnp.float32)],
        compiler_params=pltpu.CompilerParams(
            dimension_semantics=("parallel", "parallel"),
            vmem_limit_bytes=_VMEM_LIMIT),
    )(y1_nhwc, y1_nhwc, y1_nhwc, w1k, s1f, b1f, w3k, s3f, b3f)
    return out


# --------------------------------------------------------------------------
# Kernel C: fused concat + cv3 (1x1 conv on [y1, y2] with split weights;
# the (., 2c_) concat tensor never touches HBM)
# --------------------------------------------------------------------------
def _concat_pw_kernel(a_ref, b_ref, wa_ref, wb_ref, s_ref, bias_ref, o_ref):
    y = jnp.dot(a_ref[...], wa_ref[...], preferred_element_type=jnp.float32)
    y = y + jnp.dot(b_ref[...], wb_ref[...], preferred_element_type=jnp.float32)
    o_ref[...] = _silu(y * s_ref[...] + bias_ref[...]).astype(o_ref.dtype)


def concat_conv1x1_bn_silu(y1_nhwc, y2_nhwc, p, tm_target=1024):
    n, h, w, c_ = y1_nhwc.shape
    cout = p["w"].shape[0]
    m = n * h * w
    a2d = y1_nhwc.reshape(m, c_)
    b2d = y2_nhwc.reshape(m, c_)
    wf = p["w"][:, :, 0, 0]                                # (cout, 2*c_)
    wa = jnp.transpose(wf[:, :c_])                         # (c_, cout) — y1 half
    wb = jnp.transpose(wf[:, c_:])                         # (c_, cout) — y2 half
    s, bias = _fold_bn(p)
    tm = _row_tile(m, tm_target)

    out = pl.pallas_call(
        _concat_pw_kernel,
        out_shape=jax.ShapeDtypeStruct((m, cout), y1_nhwc.dtype),
        grid=(pl.cdiv(m, tm),),
        in_specs=[
            pl.BlockSpec((tm, c_), lambda i: (i, 0)),
            pl.BlockSpec((tm, c_), lambda i: (i, 0)),
            pl.BlockSpec((c_, cout), lambda i: (0, 0)),
            pl.BlockSpec((c_, cout), lambda i: (0, 0)),
            pl.BlockSpec((1, cout), lambda i: (0, 0)),
            pl.BlockSpec((1, cout), lambda i: (0, 0)),
        ],
        out_specs=pl.BlockSpec((tm, cout), lambda i: (i, 0)),
        compiler_params=pltpu.CompilerParams(
            dimension_semantics=("parallel",),
            vmem_limit_bytes=_VMEM_LIMIT),
    )(a2d, b2d, wa, wb, s, bias)
    return out.reshape(n, h, w, cout)


# --------------------------------------------------------------------------
# Parameter init (deterministic, synthetic) and the C3 forward pass
# --------------------------------------------------------------------------
def init_conv_bn(key, cin, cout, k):
    k1, k2, k3, k4, k5 = jax.random.split(key, 5)
    return dict(
        w=0.1 * jax.random.normal(k1, (cout, cin, k, k), jnp.float32),
        gamma=1.0 + 0.1 * jax.random.normal(k2, (cout,), jnp.float32),
        beta=0.1 * jax.random.normal(k3, (cout,), jnp.float32),
        rmean=0.1 * jax.random.normal(k4, (cout,), jnp.float32),
        rvar=0.5 + 0.5 * jnp.abs(jax.random.normal(k5, (cout,), jnp.float32)),
    )


def init_c3(key, c1, c2, n=1, e=0.5):
    c_ = int(c2 * e)
    keys = jax.random.split(key, 3 + 2 * n)
    return dict(
        cv1=init_conv_bn(keys[0], c1, c_, 1),
        cv2=init_conv_bn(keys[1], c1, c_, 1),
        cv3=init_conv_bn(keys[2], 2 * c_, c2, 1),
        m=[dict(cv1=init_conv_bn(keys[3 + 2 * i], c_, c_, 1),   # e=1.0 inside Bottleneck
                cv2=init_conv_bn(keys[4 + 2 * i], c_, c_, 3))
           for i in range(n)],
    )


def c3_forward(x_nchw, params):
    x = jnp.transpose(x_nchw, (0, 2, 3, 1))                  # NCHW -> NHWC
    y1, y2 = dual_conv1x1_bn_silu(x, params["cv1"], params["cv2"])
    for bp in params["m"]:                                   # Bottleneck stack
        y1 = bottleneck_fused(y1, bp)
    out = concat_conv1x1_bn_silu(y1, y2, params["cv3"])      # concat + cv3 fused
    return jnp.transpose(out, (0, 3, 1, 2))                  # NHWC -> NCHW


# --------------------------------------------------------------------------
# Pure-JAX reference (lax.conv) for the correctness check
# --------------------------------------------------------------------------
def _ref_conv_bn_silu(x_nhwc, p, k):
    w = jnp.transpose(p["w"], (2, 3, 1, 0))                  # HWIO
    pad = "SAME" if k == 3 else "VALID"
    y = lax.conv_general_dilated(
        x_nhwc, w, (1, 1), pad,
        dimension_numbers=("NHWC", "HWIO", "NHWC"))
    inv_std = 1.0 / jnp.sqrt(p["rvar"] + EPS)
    y = y * (p["gamma"] * inv_std) + (p["beta"] - p["rmean"] * p["gamma"] * inv_std)
    return y * jax.nn.sigmoid(y)


def c3_reference(x_nchw, params):
    x = jnp.transpose(x_nchw, (0, 2, 3, 1))
    y1 = _ref_conv_bn_silu(x, params["cv1"], 1)
    for bp in params["m"]:
        b1 = _ref_conv_bn_silu(y1, bp["cv1"], 1)
        y1 = y1 + _ref_conv_bn_silu(b1, bp["cv2"], 3)
    y2 = _ref_conv_bn_silu(x, params["cv2"], 1)
    cat = jnp.concatenate([y1, y2], axis=-1)
    out = _ref_conv_bn_silu(cat, params["cv3"], 1)
    return jnp.transpose(out, (0, 3, 1, 2))


if __name__ == "__main__":
    key = jax.random.PRNGKey(0)
    k_x, k_p = jax.random.split(key)

    N, C1, C2, H, W = 2, 8, 8, 16, 16
    x = jax.random.normal(k_x, (N, C1, H, W), jnp.float32)   # NCHW like PyTorch
    params = init_c3(k_p, C1, C2, n=1, e=0.5)

    out = jax.block_until_ready(c3_forward(x, params))
    ref = jax.block_until_ready(c3_reference(x, params))

    np.testing.assert_allclose(np.asarray(out), np.asarray(ref),
                               rtol=2e-3, atol=2e-3)
    assert out.shape == (N, C2, H, W)
    print("KERNEL_OK")
</pallas_src>

<mosaic_0001>
module attributes {stable_mosaic.version = 11 : i64} {
  func.func @_dual_pw_kernel(%arg0: i32, %arg1: memref<512x8xf32, #tpu.memory_space<vmem>>, %arg2: memref<8x8xf32, #tpu.memory_space<vmem>>, %arg3: memref<1x8xf32, #tpu.memory_space<vmem>>, %arg4: memref<1x8xf32, #tpu.memory_space<vmem>>, %arg5: memref<512x4xf32, #tpu.memory_space<vmem>>, %arg6: memref<512x4xf32, #tpu.memory_space<vmem>>) attributes {dimension_semantics = [#tpu.dimension_semantics<parallel>], iteration_bounds = array<i64: 1>, scalar_prefetch = 0 : i64, scratch_operands = 0 : i64, tpu.core_type = #tpu.core_type<tc>, window_params = [{transform_indices = @transform_0, window_bounds = array<i64: 512, 8>}, {pipeline_mode = #tpu.pipeline_mode<synchronous>, transform_indices = @transform_1, window_bounds = array<i64: 8, 8>}, {pipeline_mode = #tpu.pipeline_mode<synchronous>, transform_indices = @transform_2, window_bounds = array<i64: 1, 8>}, {pipeline_mode = #tpu.pipeline_mode<synchronous>, transform_indices = @transform_3, window_bounds = array<i64: 1, 8>}, {transform_indices = @transform_4, window_bounds = array<i64: 512, 4>}, {transform_indices = @transform_5, window_bounds = array<i64: 512, 4>}]} {
    %c0 = arith.constant 0 : index
    %c0_0 = arith.constant 0 : index
    %0 = vector.load %arg1[%c0, %c0_0] : memref<512x8xf32, #tpu.memory_space<vmem>>, vector<512x8xf32>
    %c0_1 = arith.constant 0 : index
    %c0_2 = arith.constant 0 : index
    %1 = vector.load %arg2[%c0_1, %c0_2] : memref<8x8xf32, #tpu.memory_space<vmem>>, vector<8x8xf32>
    %cst = arith.constant dense<0.000000e+00> : vector<512x8xf32>
    %2 = tpu.matmul %0, %1, %cst {dimension_numbers = #tpu.dot_dimension_numbers<[1], [0], [0], [1], [0, 0, 1, 1], [], []>} : vector<512x8xf32>, vector<8x8xf32>, vector<512x8xf32> -> vector<512x8xf32>
    %c0_3 = arith.constant 0 : index
    %c0_4 = arith.constant 0 : index
    %3 = vector.load %arg3[%c0_3, %c0_4] : memref<1x8xf32, #tpu.memory_space<vmem>>, vector<1x8xf32>
    %4 = vector.broadcast %3 : vector<1x8xf32> to vector<512x8xf32>
    %5 = arith.mulf %2, %4 : vector<512x8xf32>
    %c0_5 = arith.constant 0 : index
    %c0_6 = arith.constant 0 : index
    %6 = vector.load %arg4[%c0_5, %c0_6] : memref<1x8xf32, #tpu.memory_space<vmem>>, vector<1x8xf32>
    %7 = vector.broadcast %6 : vector<1x8xf32> to vector<512x8xf32>
    %8 = arith.addf %5, %7 : vector<512x8xf32>
    %cst_7 = arith.constant 5.000000e-01 : f32
    %9 = vector.broadcast %cst_7 : f32 to vector<512x8xf32>
    %10 = arith.mulf %9, %8 : vector<512x8xf32>
    %11 = math.tanh %10 : vector<512x8xf32>
    %cst_8 = arith.constant 1.000000e+00 : f32
    %12 = vector.broadcast %cst_8 : f32 to vector<512x8xf32>
    %13 = arith.addf %11, %12 : vector<512x8xf32>
    %cst_9 = arith.constant 5.000000e-01 : f32
    %14 = vector.broadcast %cst_9 : f32 to vector<512x8xf32>
    %15 = arith.mulf %14, %13 : vector<512x8xf32>
    %16 = arith.mulf %8, %15 : vector<512x8xf32>
    %17 = vector.extract_strided_slice %16 {offsets = [0, 0], sizes = [512, 4], strides = [1, 1]} : vector<512x8xf32> to vector<512x4xf32>
    %c0_10 = arith.constant 0 : index
    %c0_11 = arith.constant 0 : index
    %18 = vector.load %arg5[%c0_10, %c0_11] : memref<512x4xf32, #tpu.memory_space<vmem>>, vector<512x4xf32>
    tpu.vector_store %arg5[%c0_10, %c0_11], %17 {strides = array<i32>} : memref<512x4xf32, #tpu.memory_space<vmem>>, vector<512x4xf32>,
    %19 = vector.extract_strided_slice %16 {offsets = [0, 4], sizes = [512, 4], strides = [1, 1]} : vector<512x8xf32> to vector<512x4xf32>
    %c0_12 = arith.constant 0 : index
    %c0_13 = arith.constant 0 : index
    %20 = vector.load %arg6[%c0_12, %c0_13] : memref<512x4xf32, #tpu.memory_space<vmem>>, vector<512x4xf32>
    tpu.vector_store %arg6[%c0_12, %c0_13], %19 {strides = array<i32>} : memref<512x4xf32, #tpu.memory_space<vmem>>, vector<512x4xf32>,
    return
  }
  func.func @transform_0(%arg0: i32) -> (i32, i32) {
    %c0_i32 = arith.constant 0 : i32
    %c0_i32_0 = arith.constant 0 : i32
    return %arg0, %c0_i32 : i32, i32
  }
  func.func @transform_1(%arg0: i32) -> (i32, i32) {
    %c0_i32 = arith.constant 0 : i32
    %c0_i32_0 = arith.constant 0 : i32
    %c0_i32_1 = arith.constant 0 : i32
    return %c0_i32, %c0_i32_0 : i32, i32
  }
  func.func @transform_2(%arg0: i32) -> (i32, i32) {
    %c0_i32 = arith.constant 0 : i32
    %c0_i32_0 = arith.constant 0 : i32
    %c0_i32_1 = arith.constant 0 : i32
    return %c0_i32, %c0_i32_0 : i32, i32
  }
  func.func @transform_3(%arg0: i32) -> (i32, i32) {
    %c0_i32 = arith.constant 0 : i32
    %c0_i32_0 = arith.constant 0 : i32
    %c0_i32_1 = arith.constant 0 : i32
    return %c0_i32, %c0_i32_0 : i32, i32
  }
  func.func @transform_4(%arg0: i32) -> (i32, i32) {
    %c0_i32 = arith.constant 0 : i32
    %c0_i32_0 = arith.constant 0 : i32
    return %arg0, %c0_i32 : i32, i32
  }
  func.func @transform_5(%arg0: i32) -> (i32, i32) {
    %c0_i32 = arith.constant 0 : i32
    %c0_i32_0 = arith.constant 0 : i32
    return %arg0, %c0_i32 : i32, i32
  }
}

</mosaic_0001>

<bundles_post_ra>
// kernel: tpu_custom_call.1
= control target key start
LH: loop header
LB: loop body
LE: loop exit
PB: predicated region body
PF: predicated region fallthrough
CT: control target
= control target key end

     0   :  { %vm84_vm0 = vcmask 64512   ;;  %vm942_vm1 = vcmask 31744   ;;  %s2957_s1 = inlined_call_operand.vmem [shape: f32[8,8], index: 1, kind: input, shape index: {}]   ;;  %s2958_s0 = inlined_call_operand.vmem [shape: f32[512,8], index: 0, kind: input, shape index: {}]   ;;  %s2959_s2 = inlined_call_operand.vmem [shape: f32[1,8], index: 2, kind: input, shape index: {}]   ;;  %s2960_s3 = inlined_call_operand.vmem [shape: f32[1,8], index: 3, kind: input, shape index: {}]   ;;  %s2961_s4 = inlined_call_operand.vmem [shape: f32[512,4], index: 4, kind: output, shape index: {0}]   ;;  %s2962_s5 = inlined_call_operand.vmem [shape: f32[512,4], index: 5, kind: output, shape index: {1}]  }
   0x1   :  { %v83_v0 = vld [vmem:[%s2957_s1] sm:$0xff]  ;;  %v20_v5 = vld [vmem:[%s2958_s0 + $0x8] sm:$0xff]  ;;  %v21_v9 = vld [vmem:[%s2958_s0 + $0x10] sm:$0xff] }
   0x2   :  { %v19_v1 = vld [vmem:[%s2958_s0] sm:$0xff]  ;;  %292 = vmatpush.msra.mxu0 %v83_v0  ;;  %1399 = vmatpush.msra.mxu1 %v83_v0  ;;  %v36_v6 = vld [vmem:[%s2958_s0 + $0x88] sm:$0xff]  ;;  %v37_v10 = vld [vmem:[%s2958_s0 + $0x90] sm:$0xff] }
   0x3   :  { %v35_v2 = vld [vmem:[%s2958_s0 + $0x80] sm:$0xff]  ;;  %1400 = vmatpush.msra.mxu2 %v83_v0  ;;  %1401 = vmatpush.msra.mxu3 %v83_v0  ;;  %v52_v7 = vld [vmem:[%s2958_s0 + $0x108] sm:$0xff]  ;;  %v53_v11 = vld [vmem:[%s2958_s0 + $0x110] sm:$0xff] }
   0x4   :  { %v51_v3 = vld [vmem:[%s2958_s0 + $0x100] sm:$0xff]  ;;  %1335 = vmatmul.msk.f32.vlgmr.msra.gmra.mxu0 %vm84_vm0, %v19_v1  ;;  %1351 = vmatmul.msk.f32.vlgmr.msra.gmra.mxu1 %vm84_vm0, %v35_v2  ;;  %v68_v8 = vld [vmem:[%s2958_s0 + $0x188] sm:$0xff]  ;;  %v69_v12 = vld [vmem:[%s2958_s0 + $0x190] sm:$0xff] }
   0x5   :  { %v67_v4 = vld [vmem:[%s2958_s0 + $0x180] sm:$0xff]  ;;  %1367 = vmatmul.msk.f32.vlgmr.msra.gmra.mxu2 %vm84_vm0, %v51_v3  ;;  %v22_v13 = vld [vmem:[%s2958_s0 + $0x18] sm:$0xff]  ;;  %v24_v21 = vld [vmem:[%s2958_s0 + $0x28] sm:$0xff] }
   0x6   :  { %1383 = vmatmul.msk.f32.vlgmr.msra.gmra.mxu3 %vm84_vm0, %v67_v4  ;;  %v38_v14 = vld [vmem:[%s2958_s0 + $0x98] sm:$0xff]  ;;  %v23_v17 = vld [vmem:[%s2958_s0 + $0x20] sm:$0xff]  ;;  %v40_v22 = vld [vmem:[%s2958_s0 + $0xa8] sm:$0xff] }
   0x7   :  { %v54_v15 = vld [vmem:[%s2958_s0 + $0x118] sm:$0xff]  ;;  %v39_v18 = vld [vmem:[%s2958_s0 + $0xa0] sm:$0xff]  ;;  %v56_v23 = vld [vmem:[%s2958_s0 + $0x128] sm:$0xff] }
   0x8   :  { %v70_v16 = vld [vmem:[%s2958_s0 + $0x198] sm:$0xff]  ;;  %v55_v19 = vld [vmem:[%s2958_s0 + $0x120] sm:$0xff]  ;;  %v72_v24 = vld [vmem:[%s2958_s0 + $0x1a8] sm:$0xff] }
   0x9   :  { %v71_v20 = vld [vmem:[%s2958_s0 + $0x1a0] sm:$0xff]  ;;  %v25_v25 = vld [vmem:[%s2958_s0 + $0x30] sm:$0xff]  ;;  %v26_v29 = vld [vmem:[%s2958_s0 + $0x38] sm:$0xff] }
   0xa   :  { %v41_v26 = vld [vmem:[%s2958_s0 + $0xb0] sm:$0xff]  ;;  %v42_v30 = vld [vmem:[%s2958_s0 + $0xb8] sm:$0xff]  ;;  %v27_v33 = vld [vmem:[%s2958_s0 + $0x40] sm:$0xff] }
   0xb   :  { %v57_v27 = vld [vmem:[%s2958_s0 + $0x130] sm:$0xff]  ;;  %v58_v31 = vld [vmem:[%s2958_s0 + $0x138] sm:$0xff]  ;;  %v43_v34 = vld [vmem:[%s2958_s0 + $0xc0] sm:$0xff] }
   0xc   :  { %1336 = vmatmul.msk.f32.gmra.mxu0 %vm84_vm0, %v20_v5  ;;  %1352 = vmatmul.msk.f32.gmra.mxu1 %vm84_vm0, %v36_v6  ;;  %v73_v28 = vld [vmem:[%s2958_s0 + $0x1b0] sm:$0xff]  ;;  %v74_v32 = vld [vmem:[%s2958_s0 + $0x1b8] sm:$0xff]  ;;  %v59_v35 = vld [vmem:[%s2958_s0 + $0x140] sm:$0xff] }
   0xd   :  { %1368 = vmatmul.msk.f32.gmra.mxu2 %vm84_vm0, %v52_v7  ;;  %v75_v36 = vld [vmem:[%s2958_s0 + $0x1c0] sm:$0xff]  ;;  %v28_v37 = vld [vmem:[%s2958_s0 + $0x48] sm:$0xff]  ;;  %v29_v41 = vld [vmem:[%s2958_s0 + $0x50] sm:$0xff] }
   0xe   :  { %1384 = vmatmul.msk.f32.gmra.mxu3 %vm84_vm0, %v68_v8  ;;  %v44_v38 = vld [vmem:[%s2958_s0 + $0xc8] sm:$0xff]  ;;  %v45_v42 = vld [vmem:[%s2958_s0 + $0xd0] sm:$0xff]  ;;  %v30_v45 = vld [vmem:[%s2958_s0 + $0x58] sm:$0xff] }
   0xf   :  { %v60_v39 = vld [vmem:[%s2958_s0 + $0x148] sm:$0xff]  ;;  %v61_v43 = vld [vmem:[%s2958_s0 + $0x150] sm:$0xff]  ;;  %v46_v46 = vld [vmem:[%s2958_s0 + $0xd8] sm:$0xff] }
  0x10   :  { %v76_v40 = vld [vmem:[%s2958_s0 + $0x1c8] sm:$0xff]  ;;  %v77_v44 = vld [vmem:[%s2958_s0 + $0x1d0] sm:$0xff]  ;;  %v62_v47 = vld [vmem:[%s2958_s0 + $0x158] sm:$0xff] }
  0x11   :  { %v78_v48 = vld [vmem:[%s2958_s0 + $0x1d8] sm:$0xff]  ;;  %v31_v49 = vld [vmem:[%s2958_s0 + $0x60] sm:$0xff]  ;;  %v32_v53 = vld [vmem:[%s2958_s0 + $0x68] sm:$0xff] }
  0x12   :  { %v47_v50 = vld [vmem:[%s2958_s0 + $0xe0] sm:$0xff]  ;;  %v48_v54 = vld [vmem:[%s2958_s0 + $0xe8] sm:$0xff]  ;;  %v33_v57 = vld [vmem:[%s2958_s0 + $0x70] sm:$0xff] }
  0x13   :  { %v63_v51 = vld [vmem:[%s2958_s0 + $0x160] sm:$0xff]  ;;  %v64_v55 = vld [vmem:[%s2958_s0 + $0x168] sm:$0xff]  ;;  %v49_v58 = vld [vmem:[%s2958_s0 + $0xf0] sm:$0xff] }
  0x14   :  { %1337 = vmatmul.msk.f32.gmra.mxu0 %vm84_vm0, %v21_v9  ;;  %1353 = vmatmul.msk.f32.gmra.mxu1 %vm84_vm0, %v37_v10  ;;  %v79_v52 = vld [vmem:[%s2958_s0 + $0x1e0] sm:$0xff]  ;;  %v80_v56 = vld [vmem:[%s2958_s0 + $0x1e8] sm:$0xff]  ;;  %v65_v59 = vld [vmem:[%s2958_s0 + $0x170] sm:$0xff] }
  0x15   :  { %1369 = vmatmul.msk.f32.gmra.mxu2 %vm84_vm0, %v53_v11  ;;  %v81_v60 = vld [vmem:[%s2958_s0 + $0x1f0] sm:$0xff]  ;;  %v34_v61 = vld [vmem:[%s2958_s0 + $0x78] sm:$0xff]  ;;  %v1827_v1 = vld [vmem:[%s2959_s2] ss:$0 sm:$0xff] }
  0x16   :  { %1385 = vmatmul.msk.f32.gmra.mxu3 %vm84_vm0, %v69_v12  ;;  %v50_v62 = vld [vmem:[%s2958_s0 + $0xf8] sm:$0xff]  ;;  %v1833_v2 = vld [vmem:[%s2960_s3] ss:$0 sm:$0xff] }
  0x17   :  { %v82_v63 = vld [vmem:[%s2958_s0 + $0x1f8] sm:$0xff] }
  0x18   :  { %v66_v0 = vld [vmem:[%s2958_s0 + $0x178] sm:$0xff]  ;;  %s1535_s0 = smov 124  }
  0x1c   :  { %1338 = vmatmul.msk.f32.gmra.mxu0 %vm84_vm0, %v22_v13  ;;  %1354 = vmatmul.msk.f32.gmra.mxu1 %vm84_vm0, %v38_v14 }
  0x1d   :  { %1370 = vmatmul.msk.f32.gmra.mxu2 %vm84_vm0, %v54_v15 }
  0x1e   :  { %1386 = vmatmul.msk.f32.gmra.mxu3 %vm84_vm0, %v70_v16 }
  0x24   :  { %1339 = vmatmul.msk.f32.gmra.mxu0 %vm84_vm0, %v23_v17  ;;  %1355 = vmatmul.msk.f32.gmra.mxu1 %vm84_vm0, %v39_v18 }
  0x25   :  { %1371 = vmatmul.msk.f32.gmra.mxu2 %vm84_vm0, %v55_v19 }
  0x26   :  { %1387 = vmatmul.msk.f32.gmra.mxu3 %vm84_vm0, %v71_v20 }
  0x2c   :  { %1340 = vmatmul.msk.f32.gmra.mxu0 %vm84_vm0, %v24_v21  ;;  %1356 = vmatmul.msk.f32.gmra.mxu1 %vm84_vm0, %v40_v22 }
  0x2d   :  { %1372 = vmatmul.msk.f32.gmra.mxu2 %vm84_vm0, %v56_v23 }
  0x2e   :  { %1388 = vmatmul.msk.f32.gmra.mxu3 %vm84_vm0, %v72_v24 }
  0x34   :  { %1341 = vmatmul.msk.f32.gmra.mxu0 %vm84_vm0, %v25_v25  ;;  %1357 = vmatmul.msk.f32.gmra.mxu1 %vm84_vm0, %v41_v26 }
  0x35   :  { %1373 = vmatmul.msk.f32.gmra.mxu2 %vm84_vm0, %v57_v27 }
  0x36   :  { %1389 = vmatmul.msk.f32.gmra.mxu3 %vm84_vm0, %v73_v28 }
  0x3c   :  { %1342 = vmatmul.msk.f32.gmra.mxu0 %vm84_vm0, %v26_v29  ;;  %1358 = vmatmul.msk.f32.gmra.mxu1 %vm84_vm0, %v42_v30 }
  0x3d   :  { %1374 = vmatmul.msk.f32.gmra.mxu2 %vm84_vm0, %v58_v31 }
  0x3e   :  { %1390 = vmatmul.msk.f32.gmra.mxu3 %vm84_vm0, %v74_v32 }
  0x44   :  { %1343 = vmatmul.msk.f32.gmra.mxu0 %vm84_vm0, %v27_v33  ;;  %1359 = vmatmul.msk.f32.gmra.mxu1 %vm84_vm0, %v43_v34 }
  0x45   :  { %1375 = vmatmul.msk.f32.gmra.mxu2 %vm84_vm0, %v59_v35 }
  0x46   :  { %1391 = vmatmul.msk.f32.gmra.mxu3 %vm84_vm0, %v75_v36 }
  0x4c   :  { %1344 = vmatmul.msk.f32.gmra.mxu0 %vm84_vm0, %v28_v37  ;;  %1360 = vmatmul.msk.f32.gmra.mxu1 %vm84_vm0, %v44_v38 }
  0x4d   :  { %1376 = vmatmul.msk.f32.gmra.mxu2 %vm84_vm0, %v60_v39 }
  0x4e   :  { %1392 = vmatmul.msk.f32.gmra.mxu3 %vm84_vm0, %v76_v40 }
  0x54   :  { %1345 = vmatmul.msk.f32.gmra.mxu0 %vm84_vm0, %v29_v41  ;;  %1361 = vmatmul.msk.f32.gmra.mxu1 %vm84_vm0, %v45_v42 }
  0x55   :  { %1377 = vmatmul.msk.f32.gmra.mxu2 %vm84_vm0, %v61_v43 }
  0x56   :  { %1393 = vmatmul.msk.f32.gmra.mxu3 %vm84_vm0, %v77_v44 }
  0x5c   :  { %1346 = vmatmul.msk.f32.gmra.mxu0 %vm84_vm0, %v30_v45  ;;  %1362 = vmatmul.msk.f32.gmra.mxu1 %vm84_vm0, %v46_v46 }
  0x5d   :  { %1378 = vmatmul.msk.f32.gmra.mxu2 %vm84_vm0, %v62_v47 }
  0x5e   :  { %1394 = vmatmul.msk.f32.gmra.mxu3 %vm84_vm0, %v78_v48 }
  0x64   :  { %1347 = vmatmul.msk.f32.gmra.mxu0 %vm84_vm0, %v31_v49  ;;  %1363 = vmatmul.msk.f32.gmra.mxu1 %vm84_vm0, %v47_v50 }
  0x65   :  { %1379 = vmatmul.msk.f32.gmra.mxu2 %vm84_vm0, %v63_v51 }
  0x66   :  { %1395 = vmatmul.msk.f32.gmra.mxu3 %vm84_vm0, %v79_v52 }
  0x6c   :  { %1348 = vmatmul.msk.f32.gmra.mxu0 %vm84_vm0, %v32_v53  ;;  %1364 = vmatmul.msk.f32.gmra.mxu1 %vm84_vm0, %v48_v54 }
  0x6d   :  { %1380 = vmatmul.msk.f32.gmra.mxu2 %vm84_vm0, %v64_v55 }
  0x6e   :  { %1396 = vmatmul.msk.f32.gmra.mxu3 %vm84_vm0, %v80_v56 }
  0x74   :  { %1349 = vmatmul.msk.f32.gmra.mxu0 %vm84_vm0, %v33_v57  ;;  %1365 = vmatmul.msk.f32.gmra.mxu1 %vm84_vm0, %v49_v58 }
  0x75   :  { %1381 = vmatmul.msk.f32.gmra.mxu2 %vm84_vm0, %v65_v59 }
  0x76   :  { %1397 = vmatmul.msk.f32.gmra.mxu3 %vm84_vm0, %v81_v60 }
  0x7c   :  { %1350 = vmatmul.msk.f32.gmra.mxu0 %vm84_vm0, %v34_v61  ;;  %1366 = vmatmul.msk.f32.gmra.mxu1 %vm84_vm0, %v50_v62 }
  0x7d   :  { %1382 = vmatmul.msk.f32.gmra.mxu2 %vm84_vm0, %v66_v0 }
  0x7e   :  { %1398 = vmatmul.msk.f32.gmra.mxu3 %vm84_vm0, %v82_v63 }
  0x81   :  { %v294_v3 = vpop.f32.mrf.mxu0  ;;  %v342_v4 = vpop.f32.mrf.mxu1 }
  0x82   :  { %v490_v5 = vmul.f32 %v1827_v1, %v294_v3  ;;  %v506_v6 = vmul.f32 %v1827_v1, %v342_v4 }
  0x84   :  { %v558_v7 = vadd.f32 %v1833_v2, %v490_v5  ;;  %v574_v8 = vadd.f32 %v1833_v2, %v506_v6 }
  0x86   :  { %v622_v9 = vmul.f32 0.5, %v558_v7  ;;  %v638_v10 = vmul.f32 0.5, %v574_v8 }
  0x88   :  { %1405 = vtanh.f32 %v622_v9  ;;  %v390_v11 = vpop.f32.mrf.mxu2 }
  0x89   :  { %v438_v12 = vpop.f32.mrf.mxu3  ;;  %1407 = vtanh.f32 %v638_v10  ;;  %v522_v13 = vmul.f32 %v1827_v1, %v390_v11  ;;  %v297_v15 = vpop.f32.mrf.mxu0 }
  0x8a   :  { %v538_v14 = vmul.f32 %v1827_v1, %v438_v12  ;;  %v345_v16 = vpop.f32.mrf.mxu1  ;;  %v491_v17 = vmul.f32 %v1827_v1, %v297_v15 }
  0x8b   :  { %v507_v18 = vmul.f32 %v1827_v1, %v345_v16  ;;  %v590_v19 = vadd.f32 %v1833_v2, %v522_v13 }
  0x8c   :  { %v1845_v20 = vadd.f32 %v1833_v2, %v538_v14  ;;  %v1848_v21 = vadd.f32 %v1833_v2, %v491_v17 }
  0x8d   :  { %v1851_v22 = vadd.f32 %v1833_v2, %v507_v18  ;;  %v654_v23 = vmul.f32 0.5, %v590_v19 }
  0x8e   :  { %v670_v24 = vmul.f32 0.5, %v1845_v20  ;;  %v1406_v25 = vpop.eup %1405  ;;  %v623_v26 = vmul.f32 0.5, %v1848_v21 }
  0x8f   :  { %v639_v27 = vmul.f32 0.5, %v1851_v22  ;;  %v1408_v28 = vpop.eup %1407  ;;  %1409 = vtanh.f32 %v654_v23  ;;  %v750_v29 = vadd.f32 1.0, %v1406_v25 }
  0x90   :  { %1411 = vtanh.f32 %v670_v24  ;;  %v393_v30 = vpop.f32.mrf.mxu2  ;;  %v766_v32 = vadd.f32 1.0, %v1408_v28 }
  0x91   :  { %v441_v31 = vpop.f32.mrf.mxu3  ;;  %1413 = vtanh.f32 %v623_v26  ;;  %v523_v33 = vmul.f32 %v1827_v1, %v393_v30  ;;  %v300_v35 = vpop.f32.mrf.mxu0  ;;  %v814_v37 = vmul.f32 0.5, %v750_v29 }
  0x92   :  { %v539_v34 = vmul.f32 %v1827_v1, %v441_v31  ;;  %v348_v36 = vpop.f32.mrf.mxu1  ;;  %1415 = vtanh.f32 %v639_v27  ;;  %v492_v38 = vmul.f32 %v1827_v1, %v300_v35  ;;  %v830_v40 = vmul.f32 0.5, %v766_v32 }
  0x93   :  { %v508_v39 = vmul.f32 %v1827_v1, %v348_v36  ;;  %v1861_v41 = vadd.f32 %v1833_v2, %v523_v33  ;;  %v878_v43 = vmul.f32 %v814_v37, %v558_v7 }
  0x94   :  { %v1864_v42 = vadd.f32 %v1833_v2, %v539_v34  ;;  %v1867_v44 = vadd.f32 %v1833_v2, %v492_v38  ;;  %v894_v46 = vmul.f32 %v830_v40, %v574_v8 }
  0x95   :  { %v1870_v45 = vadd.f32 %v1833_v2, %v508_v39  ;;  %v1410_v47 = vpop.eup %1409  ;;  %v655_v48 = vmul.f32 0.5, %v1861_v41  ;;  %1071 = vrot.lane.b32.xlu0 %v878_v43, %s1535_s0  ;;  %943 = vst.msk [vmem:[%s2961_s4] sm:$0xff] %vm942_vm1, %v878_v43 }
  0x96   :  { %v671_v49 = vmul.f32 0.5, %v1864_v42  ;;  %v1412_v50 = vpop.eup %1411  ;;  %v624_v51 = vmul.f32 0.5, %v1867_v44  ;;  %1103 = vrot.lane.b32.xlu1 %v894_v46, %s1535_s0  ;;  %959 = vst.msk [vmem:[%s2961_s4 + $0x80] sm:$0xff] %vm942_vm1, %v894_v46  ;;  %v782_v53 = vadd.f32 1.0, %v1410_v47 }
  0x97   :  { %v640_v52 = vmul.f32 0.5, %v1870_v45  ;;  %v1414_v54 = vpop.eup %1413  ;;  %1417 = vtanh.f32 %v655_v48  ;;  %v798_v55 = vadd.f32 1.0, %v1412_v50 }
  0x98   :  { %v1416_v56 = vpop.eup %1415  ;;  %1419 = vtanh.f32 %v671_v49  ;;  %v396_v57 = vpop.f32.mrf.mxu2  ;;  %v846_v59 = vmul.f32 0.5, %v782_v53  ;;  %v751_v60 = vadd.f32 1.0, %v1414_v54 }
  0x99   :  { %v444_v58 = vpop.f32.mrf.mxu3  ;;  %1421 = vtanh.f32 %v624_v51  ;;  %v524_v61 = vmul.f32 %v1827_v1, %v396_v57  ;;  %v303_v63 = vpop.f32.mrf.mxu0  ;;  %v862_v3 = vmul.f32 0.5, %v798_v55  ;;  %v767_v10 = vadd.f32 1.0, %v1416_v56 }
  0x9a   :  { %v540_v62 = vmul.f32 %v1827_v1, %v444_v58  ;;  %v351_v0 = vpop.f32.mrf.mxu1  ;;  %1423 = vtanh.f32 %v640_v52  ;;  %v910_v4 = vmul.f32 %v846_v59, %v590_v19  ;;  %v493_v5 = vmul.f32 %v1827_v1, %v303_v63 }
  0x9b   :  { %v509_v6 = vmul.f32 %v1827_v1, %v351_v0  ;;  %v1891_v7 = vadd.f32 %v1833_v2, %v524_v61  ;;  %v926_v9 = vmul.f32 %v862_v3, %v1845_v20  ;;  %v815_v13 = vmul.f32 0.5, %v751_v60 }
  0x9c   :  { %v1894_v8 = vadd.f32 %v1833_v2, %v540_v62  ;;  %1135 = vrot.lane.b32.xlu2 %v910_v4, %s1535_s0  ;;  %975 = vst.msk [vmem:[%s2961_s4 + $0x100] sm:$0xff] %vm942_vm1, %v910_v4  ;;  %v1903_v11 = vadd.f32 %v1833_v2, %v493_v5  ;;  %v831_v17 = vmul.f32 0.5, %v767_v10 }
  0x9d   :  { %v1906_v12 = vadd.f32 %v1833_v2, %v509_v6  ;;  %v1418_v14 = vpop.eup %1417  ;;  %v656_v15 = vmul.f32 0.5, %v1891_v7  ;;  %991 = vst.msk [vmem:[%s2961_s4 + $0x180] sm:$0xff] %vm942_vm1, %v926_v9  ;;  %1167 = vrot.lane.b32.xlu0 %v926_v9, %s1535_s0  ;;  %v879_v23 = vmul.f32 %v815_v13, %v1848_v21 }
  0x9e   :  { %v672_v16 = vmul.f32 0.5, %v1894_v8  ;;  %v1420_v18 = vpop.eup %1419  ;;  %v625_v19 = vmul.f32 0.5, %v1903_v11  ;;  %v783_v24 = vadd.f32 1.0, %v1418_v14  ;;  %v895_v27 = vmul.f32 %v831_v17, %v1851_v22 }
  0x9f   :  { %v641_v20 = vmul.f32 0.5, %v1906_v12  ;;  %v1422_v25 = vpop.eup %1421  ;;  %1425 = vtanh.f32 %v656_v15  ;;  %v799_v26 = vadd.f32 1.0, %v1420_v18  ;;  %944 = vst.msk [vmem:[%s2961_s4 + $0x8] sm:$0xff] %vm942_vm1, %v879_v23 }
  0xa0   :  { %v1424_v28 = vpop.eup %1423  ;;  %1427 = vtanh.f32 %v672_v16  ;;  %v399_v29 = vpop.f32.mrf.mxu2  ;;  %v752_v31 = vadd.f32 1.0, %v1422_v25  ;;  %v847_v32 = vmul.f32 0.5, %v783_v24  ;;  %960 = vst.msk [vmem:[%s2961_s4 + $0x88] sm:$0xff] %vm942_vm1, %v895_v27 }
  0xa1   :  { %v447_v30 = vpop.f32.mrf.mxu3  ;;  %1429 = vtanh.f32 %v625_v19  ;;  %v525_v21 = vmul.f32 %v1827_v1, %v399_v29  ;;  %v863_v34 = vmul.f32 0.5, %v799_v26  ;;  %v306_v22 = vpop.f32.mrf.mxu0  ;;  %v768_v50 = vadd.f32 1.0, %v1424_v28 }
  0xa2   :  { %v541_v33 = vmul.f32 %v1827_v1, %v447_v30  ;;  %v354_v35 = vpop.f32.mrf.mxu1  ;;  %1431 = vtanh.f32 %v641_v20  ;;  %v494_v36 = vmul.f32 %v1827_v1, %v306_v22  ;;  %v816_v38 = vmul.f32 0.5, %v752_v31 }
  0xa3   :  { %v510_v37 = vmul.f32 %v1827_v1, %v354_v35  ;;  %v1932_v39 = vadd.f32 %v1833_v2, %v525_v21  ;;  %v927_v43 = vmul.f32 %v863_v34, %v1864_v42  ;;  %v911_v46 = vmul.f32 %v847_v32, %v1861_v41 }
  0xa4   :  { %v1935_v40 = vadd.f32 %v1833_v2, %v541_v33  ;;  %1105 = vrot.lane.b32.xlu2 %v895_v27, %s1535_s0  ;;  %v1941_v47 = vadd.f32 %v1833_v2, %v494_v36  ;;  %v880_v49 = vmul.f32 %v816_v38, %v1867_v44  ;;  %v832_v55 = vmul.f32 0.5, %v768_v50 }
  0xa5   :  { %v1944_v48 = vadd.f32 %v1833_v2, %v510_v37  ;;  %v1426_v51 = vpop.eup %1425  ;;  %v657_v52 = vmul.f32 0.5, %v1932_v39  ;;  %992 = vst.msk [vmem:[%s2961_s4 + $0x188] sm:$0xff] %vm942_vm1, %v927_v43  ;;  %1169 = vrot.lane.b32.xlu1 %v927_v43, %s1535_s0  ;;  %1073 = vrot.lane.b32.xlu0 %v879_v23, %s1535_s0 }
  0xa6   :  { %v673_v53 = vmul.f32 0.5, %v1935_v40  ;;  %v1428_v41 = vpop.eup %1427  ;;  %v626_v42 = vmul.f32 0.5, %v1941_v47  ;;  %945 = vst.msk [vmem:[%s2961_s4 + $0x10] sm:$0xff] %vm942_vm1, %v880_v49  ;;  %v784_v54 = vadd.f32 1.0, %v1426_v51  ;;  %v1966_v62 = vmul.f32 %v832_v55, %v1870_v45 }
  0xa7   :  { %v642_v44 = vmul.f32 0.5, %v1944_v48  ;;  %v1430_v56 = vpop.eup %1429  ;;  %1433 = vtanh.f32 %v657_v52  ;;  %v800_v57 = vadd.f32 1.0, %v1428_v41  ;;  %976 = vst.msk [vmem:[%s2961_s4 + $0x108] sm:$0xff] %vm942_vm1, %v911_v46 }
  0xa8   :  { %v1432_v58 = vpop.eup %1431  ;;  %1435 = vtanh.f32 %v673_v53  ;;  %v402_v59 = vpop.f32.mrf.mxu2  ;;  %v848_v61 = vmul.f32 0.5, %v784_v54  ;;  %v753_v63 = vadd.f32 1.0, %v1430_v56  ;;  %961 = vst.msk [vmem:[%s2961_s4 + $0x90] sm:$0xff] %vm942_vm1, %v1966_v62 }
  0xa9   :  { %v450_v60 = vpop.f32.mrf.mxu3  ;;  %1437 = vtanh.f32 %v626_v42  ;;  %v526_v0 = vmul.f32 %v1827_v1, %v402_v59  ;;  %v864_v3 = vmul.f32 0.5, %v800_v57  ;;  %v309_v4 = vpop.f32.mrf.mxu0  ;;  %v769_v18 = vadd.f32 1.0, %v1432_v58 }
  0xaa   :  { %v357_v5 = vpop.f32.mrf.mxu1  ;;  %v542_v6 = vmul.f32 %v1827_v1, %v450_v60  ;;  %1439 = vtanh.f32 %v642_v44  ;;  %v495_v9 = vmul.f32 %v1827_v1, %v309_v4  ;;  %v912_v13 = vmul.f32 %v848_v61, %v1891_v7 }
  0xab   :  { %v511_v10 = vmul.f32 %v1827_v1, %v357_v5  ;;  %v1979_v45 = vadd.f32 %v1833_v2, %v526_v0  ;;  %v928_v14 = vmul.f32 %v864_v3, %v1894_v8  ;;  %v817_v16 = vmul.f32 0.5, %v753_v63 }
  0xac   :  { %v1983_v15 = vadd.f32 %v1833_v2, %v542_v6  ;;  %v1986_v17 = vadd.f32 %v1833_v2, %v495_v9  ;;  %977 = vst.msk [vmem:[%s2961_s4 + $0x110] sm:$0xff] %vm942_vm1, %v912_v13  ;;  %v833_v28 = vmul.f32 0.5, %v769_v18 }
  0xad   :  { %v1989_v7 = vadd.f32 %v1833_v2, %v511_v10  ;;  %v1434_v19 = vpop.eup %1433  ;;  %v658_v20 = vmul.f32 0.5, %v1979_v45  ;;  %993 = vst.msk [vmem:[%s2961_s4 + $0x190] sm:$0xff] %vm942_vm1, %v928_v14  ;;  %1171 = vrot.lane.b32.xlu2 %v928_v14, %s1535_s0  ;;  %1075 = vrot.lane.b32.xlu1 %v880_v49, %s1535_s0  ;;  %v2004_v23 = vmul.f32 %v817_v16, %v1903_v11 }
  0xae   :  { %v674_v8 = vmul.f32 0.5, %v1983_v15  ;;  %v1436_v24 = vpop.eup %1435  ;;  %v627_v25 = vmul.f32 0.5, %v1986_v17  ;;  %1137 = vrot.lane.b32.xlu0 %v911_v46, %s1535_s0  ;;  %v785_v27 = vadd.f32 1.0, %v1434_v19  ;;  %v2015_v34 = vmul.f32 %v833_v28, %v1906_v12 }
  0xaf   :  { %v643_v26 = vmul.f32 0.5, %v1989_v7  ;;  %v1438_v29 = vpop.eup %1437  ;;  %1441 = vtanh.f32 %v658_v20  ;;  %946 = vst.msk [vmem:[%s2961_s4 + $0x18] sm:$0xff] %vm942_vm1, %v2004_v23  ;;  %v801_v30 = vadd.f32 1.0, %v1436_v24 }
  0xb0   :  { %v1440_v11 = vpop.eup %1439  ;;  %1443 = vtanh.f32 %v627_v25  ;;  %v849_v31 = vmul.f32 0.5, %v785_v27  ;;  %v405_v32 = vpop.f32.mrf.mxu2  ;;  %v754_v33 = vadd.f32 1.0, %v1438_v29  ;;  %962 = vst.msk [vmem:[%s2961_s4 + $0x98] sm:$0xff] %vm942_vm1, %v2015_v34 }
  0xb1   :  { %v453_v21 = vpop.f32.mrf.mxu3  ;;  %1445 = vtanh.f32 %v643_v26  ;;  %v312_v22 = vpop.f32.mrf.mxu0  ;;  %v527_v35 = vmul.f32 %v1827_v1, %v405_v32  ;;  %v865_v38 = vmul.f32 0.5, %v801_v30  ;;  %v770_v41 = vadd.f32 1.0, %v1440_v11 }
  0xb2   :  { %v543_v36 = vmul.f32 %v1827_v1, %v453_v21  ;;  %v360_v37 = vpop.f32.mrf.mxu1  ;;  %1447 = vtanh.f32 %v674_v8  ;;  %v913_v43 = vmul.f32 %v849_v31, %v1932_v39  ;;  %v496_v46 = vmul.f32 %v1827_v1, %v312_v22 }
  0xb3   :  { %v818_v49 = vmul.f32 0.5, %v754_v33  ;;  %v2027_v12 = vadd.f32 %v1833_v2, %v527_v35  ;;  %v512_v51 = vmul.f32 %v1827_v1, %v360_v37  ;;  %v929_v52 = vmul.f32 %v865_v38, %v1935_v40 }
  0xb4   :  { %v2030_v50 = vadd.f32 %v1833_v2, %v543_v36  ;;  %978 = vst.msk [vmem:[%s2961_s4 + $0x118] sm:$0xff] %vm942_vm1, %v913_v43  ;;  %v2039_v39 = vadd.f32 %v1833_v2, %v496_v46  ;;  %v834_v56 = vmul.f32 0.5, %v770_v41 }
  0xb5   :  { %v882_v53 = vmul.f32 %v818_v49, %v1941_v47  ;;  %v1442_v42 = vpop.eup %1441  ;;  %1141 = vrot.lane.b32.xlu2 %v913_v43, %s1535_s0  ;;  %1139 = vrot.lane.b32.xlu1 %v912_v13, %s1535_s0  ;;  %v659_v44 = vmul.f32 0.5, %v2027_v12  ;;  %v2047_v54 = vadd.f32 %v1833_v2, %v512_v51  ;;  %994 = vst.msk [vmem:[%s2961_s4 + $0x198] sm:$0xff] %vm942_vm1, %v929_v52 }
  0xb6   :  { %v675_v40 = vmul.f32 0.5, %v2030_v50  ;;  %v1444_v55 = vpop.eup %1443  ;;  %v628_v47 = vmul.f32 0.5, %v2039_v39  ;;  %1107 = vrot.lane.b32.xlu0 %v1966_v62, %s1535_s0  ;;  %v786_v57 = vadd.f32 1.0, %v1442_v42  ;;  %v2062_v3 = vmul.f32 %v834_v56, %v1944_v48 }
  0xb7   :  { %947 = vst.msk [vmem:[%s2961_s4 + $0x20] sm:$0xff] %vm942_vm1, %v882_v53  ;;  %v1446_v58 = vpop.eup %1445  ;;  %1449 = vtanh.f32 %v659_v44  ;;  %v644_v59 = vmul.f32 0.5, %v2047_v54  ;;  %v755_v60 = vadd.f32 1.0, %v1444_v55 }
  0xb8   :  { %v1448_v61 = vpop.eup %1447  ;;  %1451 = vtanh.f32 %v628_v47  ;;  %v408_v63 = vpop.f32.mrf.mxu2  ;;  %v850_v62 = vmul.f32 0.5, %v786_v57  ;;  %v771_v4 = vadd.f32 1.0, %v1446_v58  ;;  %963 = vst.msk [vmem:[%s2961_s4 + $0xa0] sm:$0xff] %vm942_vm1, %v2062_v3 }
  0xb9   :  { %v456_v0 = vpop.f32.mrf.mxu3  ;;  %1453 = vtanh.f32 %v675_v40  ;;  %v528_v5 = vmul.f32 %v1827_v1, %v408_v63  ;;  %v315_v9 = vpop.f32.mrf.mxu0  ;;  %v802_v13 = vadd.f32 1.0, %v1448_v61  ;;  %v819_v8 = vmul.f32 0.5, %v755_v60 }
  0xba   :  { %v544_v6 = vmul.f32 %v1827_v1, %v456_v0  ;;  %v363_v10 = vpop.f32.mrf.mxu1  ;;  %1455 = vtanh.f32 %v644_v59  ;;  %v497_v48 = vmul.f32 %v1827_v1, %v315_v9  ;;  %v914_v16 = vmul.f32 %v850_v62, %v1979_v45 }
  0xbb   :  { %v513_v14 = vmul.f32 %v1827_v1, %v363_v10  ;;  %v2075_v18 = vadd.f32 %v1833_v2, %v528_v5  ;;  %v866_v20 = vmul.f32 0.5, %v802_v13  ;;  %v835_v45 = vmul.f32 0.5, %v771_v4 }
  0xbc   :  { %v2078_v19 = vadd.f32 %v1833_v2, %v544_v6  ;;  %v2081_v24 = vadd.f32 %v1833_v2, %v497_v48  ;;  %979 = vst.msk [vmem:[%s2961_s4 + $0x120] sm:$0xff] %vm942_vm1, %v914_v16  ;;  %v2099_v30 = vmul.f32 %v819_v8, %v1986_v17 }
  0xbd   :  { %v2084_v25 = vadd.f32 %v1833_v2, %v513_v14  ;;  %v1450_v26 = vpop.eup %1449  ;;  %1077 = vrot.lane.b32.xlu1 %v2004_v23, %s1535_s0  ;;  %1079 = vrot.lane.b32.xlu2 %v882_v53, %s1535_s0  ;;  %v660_v27 = vmul.f32 0.5, %v2075_v18  ;;  %v2096_v29 = vmul.f32 %v866_v20, %v1983_v15  ;;  %v2105_v23 = vmul.f32 %v835_v45, %v1989_v7 }
  0xbe   :  { %v676_v28 = vmul.f32 0.5, %v2078_v19  ;;  %v1452_v11 = vpop.eup %1451  ;;  %1173 = vrot.lane.b32.xlu0 %v929_v52, %s1535_s0  ;;  %v629_v31 = vmul.f32 0.5, %v2081_v24  ;;  %v787_v21 = vadd.f32 1.0, %v1450_v26  ;;  %948 = vst.msk [vmem:[%s2961_s4 + $0x28] sm:$0xff] %vm942_vm1, %v2099_v30 }
  0xbf   :  { %v645_v32 = vmul.f32 0.5, %v2084_v25  ;;  %v1454_v33 = vpop.eup %1453  ;;  %1457 = vtanh.f32 %v660_v27  ;;  %995 = vst.msk [vmem:[%s2961_s4 + $0x1a0] sm:$0xff] %vm942_vm1, %v2096_v29  ;;  %v756_v15 = vadd.f32 1.0, %v1452_v11 }
  0xc0   :  { %v1456_v17 = vpop.eup %1455  ;;  %1459 = vtanh.f32 %v676_v28  ;;  %v411_v22 = vpop.f32.mrf.mxu2  ;;  %v851_v35 = vmul.f32 0.5, %v787_v21  ;;  %v803_v36 = vadd.f32 1.0, %v1454_v33  ;;  %964 = vst.msk [vmem:[%s2961_s4 + $0xa8] sm:$0xff] %vm942_vm1, %v2105_v23 }
  0xc1   :  { %v459_v7 = vpop.f32.mrf.mxu3  ;;  %1461 = vtanh.f32 %v629_v31  ;;  %v529_v37 = vmul.f32 %v1827_v1, %v411_v22  ;;  %v318_v38 = vpop.f32.mrf.mxu0  ;;  %v820_v49 = vmul.f32 0.5, %v756_v15 }
  0xc2   :  { %v366_v43 = vpop.f32.mrf.mxu1  ;;  %v545_v46 = vmul.f32 %v1827_v1, %v459_v7  ;;  %1463 = vtanh.f32 %v645_v32  ;;  %v498_v51 = vmul.f32 %v1827_v1, %v318_v38  ;;  %v2127_v53 = vmul.f32 %v851_v35, %v2027_v12 }
  0xc3   :  { %v514_v52 = vmul.f32 %v1827_v1, %v366_v43  ;;  %v2130_v41 = vadd.f32 %v1833_v2, %v529_v37  ;;  %v867_v44 = vmul.f32 0.5, %v803_v36  ;;  %v2136_v40 = vmul.f32 %v820_v49, %v2039_v39 }
  0xc4   :  { %v2133_v42 = vadd.f32 %v1833_v2, %v545_v46  ;;  %v2139_v55 = vadd.f32 %v1833_v2, %v498_v51  ;;  %980 = vst.msk [vmem:[%s2961_s4 + $0x128] sm:$0xff] %vm942_vm1, %v2127_v53  ;;  %v772_v12 = vadd.f32 1.0, %v1456_v17 }
  0xc5   :  { %v2142_v47 = vadd.f32 %v1833_v2, %v514_v52  ;;  %v1458_v56 = vpop.eup %1457  ;;  %1109 = vrot.lane.b32.xlu1 %v2015_v34, %s1535_s0  ;;  %1111 = vrot.lane.b32.xlu2 %v2062_v3, %s1535_s0  ;;  %v661_v39 = vmul.f32 0.5, %v2130_v41  ;;  %v2156_v58 = vmul.f32 %v867_v44, %v2030_v50  ;;  %949 = vst.msk [vmem:[%s2961_s4 + $0x30] sm:$0xff] %vm942_vm1, %v2136_v40 }
  0xc6   :  { %v677_v57 = vmul.f32 0.5, %v2133_v42  ;;  %v1460_v59 = vpop.eup %1459  ;;  %1143 = vrot.lane.b32.xlu0 %v914_v16, %s1535_s0  ;;  %v630_v34 = vmul.f32 0.5, %v2139_v55  ;;  %v836_v61 = vmul.f32 0.5, %v772_v12  ;;  %v788_v63 = vadd.f32 1.0, %v1458_v56 }
  0xc7   :  { %v646_v60 = vmul.f32 0.5, %v2142_v47  ;;  %v1462_v0 = vpop.eup %1461  ;;  %1465 = vtanh.f32 %v661_v39  ;;  %996 = vst.msk [vmem:[%s2961_s4 + $0x1a8] sm:$0xff] %vm942_vm1, %v2156_v58  ;;  %v804_v50 = vadd.f32 1.0, %v1460_v59 }
  0xc8   :  { %v1464_v3 = vpop.eup %1463  ;;  %1467 = vtanh.f32 %v630_v34  ;;  %v414_v62 = vpop.f32.mrf.mxu2  ;;  %v2172_v5 = vmul.f32 %v836_v61, %v2047_v54  ;;  %v852_v6 = vmul.f32 0.5, %v788_v63  ;;  %v757_v9 = vadd.f32 1.0, %v1462_v0 }
  0xc9   :  { %v462_v4 = vpop.f32.mrf.mxu3  ;;  %1469 = vtanh.f32 %v646_v60  ;;  %v321_v10 = vpop.f32.mrf.mxu0  ;;  %v530_v13 = vmul.f32 %v1827_v1, %v414_v62  ;;  %v868_v16 = vmul.f32 0.5, %v804_v50  ;;  %v773_v28 = vadd.f32 1.0, %v1464_v3 }
  0xca   :  { %v546_v48 = vmul.f32 %v1827_v1, %v462_v4  ;;  %v369_v14 = vpop.f32.mrf.mxu1  ;;  %1471 = vtanh.f32 %v677_v57  ;;  %v499_v20 = vmul.f32 %v1827_v1, %v321_v10  ;;  %965 = vst.msk [vmem:[%s2961_s4 + $0xb0] sm:$0xff] %vm942_vm1, %v2172_v5  ;;  %v2183_v54 = vmul.f32 %v852_v6, %v2075_v18 }
  0xcb   :  { %v515_v8 = vmul.f32 %v1827_v1, %v369_v14  ;;  %v2187_v45 = vadd.f32 %v1833_v2, %v530_v13  ;;  %v2193_v27 = vmul.f32 %v868_v16, %v2078_v19  ;;  %v821_v31 = vmul.f32 0.5, %v757_v9 }
  0xcc   :  { %v2190_v26 = vadd.f32 %v1833_v2, %v546_v48  ;;  %v2196_v11 = vadd.f32 %v1833_v2, %v499_v20  ;;  %981 = vst.msk [vmem:[%s2961_s4 + $0x130] sm:$0xff] %vm942_vm1, %v2183_v54  ;;  %v837_v33 = vmul.f32 0.5, %v773_v28 }
  0xcd   :  { %v2204_v18 = vadd.f32 %v1833_v2, %v515_v8  ;;  %v1466_v32 = vpop.eup %1465  ;;  %1175 = vrot.lane.b32.xlu1 %v2096_v29, %s1535_s0  ;;  %1081 = vrot.lane.b32.xlu2 %v2099_v30, %s1535_s0  ;;  %v662_v19 = vmul.f32 0.5, %v2187_v45  ;;  %997 = vst.msk [vmem:[%s2961_s4 + $0x1b0] sm:$0xff] %vm942_vm1, %v2193_v27  ;;  %v2222_v30 = vmul.f32 %v821_v31, %v2081_v24 }
  0xce   :  { %v678_v21 = vmul.f32 0.5, %v2190_v26  ;;  %v1468_v15 = vpop.eup %1467  ;;  %1113 = vrot.lane.b32.xlu0 %v2105_v23, %s1535_s0  ;;  %v631_v29 = vmul.f32 0.5, %v2196_v11  ;;  %v789_v22 = vadd.f32 1.0, %v1466_v32  ;;  %v2225_v35 = vmul.f32 %v837_v33, %v2084_v25 }
  0xcf   :  { %v647_v17 = vmul.f32 0.5, %v2204_v18  ;;  %v1470_v7 = vpop.eup %1469  ;;  %1473 = vtanh.f32 %v662_v19  ;;  %v758_v36 = vadd.f32 1.0, %v1468_v15  ;;  %950 = vst.msk [vmem:[%s2961_s4 + $0x38] sm:$0xff] %vm942_vm1, %v2222_v30 }
  0xd0   :  { %v1472_v37 = vpop.eup %1471  ;;  %1475 = vtanh.f32 %v631_v29  ;;  %v417_v38 = vpop.f32.mrf.mxu2  ;;  %v853_v23 = vmul.f32 0.5, %v789_v22  ;;  %v774_v24 = vadd.f32 1.0, %v1470_v7  ;;  %966 = vst.msk [vmem:[%s2961_s4 + $0xb8] sm:$0xff] %vm942_vm1, %v2225_v35 }
  0xd1   :  { %v465_v43 = vpop.f32.mrf.mxu3  ;;  %1477 = vtanh.f32 %v678_v21  ;;  %v531_v46 = vmul.f32 %v1827_v1, %v417_v38  ;;  %v324_v25 = vpop.f32.mrf.mxu0  ;;  %v805_v52 = vadd.f32 1.0, %v1472_v37  ;;  %v822_v34 = vmul.f32 0.5, %v758_v36 }
  0xd2   :  { %v547_v49 = vmul.f32 %v1827_v1, %v465_v43  ;;  %v372_v51 = vpop.f32.mrf.mxu1  ;;  %1479 = vtanh.f32 %v647_v17  ;;  %v500_v44 = vmul.f32 %v1827_v1, %v324_v25  ;;  %v2242_v56 = vmul.f32 %v853_v23, %v2130_v41 }
  0xd3   :  { %v516_v12 = vmul.f32 %v1827_v1, %v372_v51  ;;  %v2245_v39 = vadd.f32 %v1833_v2, %v531_v46  ;;  %v869_v59 = vmul.f32 0.5, %v805_v52  ;;  %v838_v41 = vmul.f32 0.5, %v774_v24 }
  0xd4   :  { %v2248_v57 = vadd.f32 %v1833_v2, %v547_v49  ;;  %v2251_v60 = vadd.f32 %v1833_v2, %v500_v44  ;;  %982 = vst.msk [vmem:[%s2961_s4 + $0x138] sm:$0xff] %vm942_vm1, %v2242_v56  ;;  %v2271_v62 = vmul.f32 %v822_v34, %v2139_v55 }
  0xd5   :  { %v2254_v61 = vadd.f32 %v1833_v2, %v516_v12  ;;  %v1474_v63 = vpop.eup %1473  ;;  %1145 = vrot.lane.b32.xlu1 %v2127_v53, %s1535_s0  ;;  %1177 = vrot.lane.b32.xlu2 %v2156_v58, %s1535_s0  ;;  %v663_v0 = vmul.f32 0.5, %v2245_v39  ;;  %v2268_v3 = vmul.f32 %v869_v59, %v2133_v42  ;;  %v2278_v58 = vmul.f32 %v838_v41, %v2142_v47 }
  0xd6   :  { %v679_v50 = vmul.f32 0.5, %v2248_v57  ;;  %v1476_v4 = vpop.eup %1475  ;;  %1083 = vrot.lane.b32.xlu0 %v2136_v40, %s1535_s0  ;;  %v632_v6 = vmul.f32 0.5, %v2251_v60  ;;  %v790_v9 = vadd.f32 1.0, %v1474_v63  ;;  %951 = vst.msk [vmem:[%s2961_s4 + $0x40] sm:$0xff] %vm942_vm1, %v2271_v62 }
  0xd7   :  { %v648_v53 = vmul.f32 0.5, %v2254_v61  ;;  %v1478_v10 = vpop.eup %1477  ;;  %1481 = vtanh.f32 %v663_v0  ;;  %998 = vst.msk [vmem:[%s2961_s4 + $0x1b8] sm:$0xff] %vm942_vm1, %v2268_v3  ;;  %v759_v42 = vadd.f32 1.0, %v1476_v4 }
  0xd8   :  { %v1480_v55 = vpop.eup %1479  ;;  %1483 = vtanh.f32 %v679_v50  ;;  %v420_v40 = vpop.f32.mrf.mxu2  ;;  %v854_v13 = vmul.f32 0.5, %v790_v9  ;;  %v806_v48 = vadd.f32 1.0, %v1478_v10  ;;  %967 = vst.msk [vmem:[%s2961_s4 + $0xc0] sm:$0xff] %vm942_vm1, %v2278_v58 }
  0xd9   :  { %v468_v47 = vpop.f32.mrf.mxu3  ;;  %1485 = vtanh.f32 %v632_v6  ;;  %v532_v14 = vmul.f32 %v1827_v1, %v420_v40  ;;  %v327_v16 = vpop.f32.mrf.mxu0  ;;  %v823_v28 = vmul.f32 0.5, %v759_v42 }
  0xda   :  { %v375_v20 = vpop.f32.mrf.mxu1  ;;  %v548_v8 = vmul.f32 %v1827_v1, %v468_v47  ;;  %1487 = vtanh.f32 %v648_v53  ;;  %v501_v31 = vmul.f32 %v1827_v1, %v327_v16  ;;  %v2300_v19 = vmul.f32 %v854_v13, %v2187_v45 }
  0xdb   :  { %v517_v32 = vmul.f32 %v1827_v1, %v375_v20  ;;  %v2303_v21 = vadd.f32 %v1833_v2, %v532_v14  ;;  %v870_v15 = vmul.f32 0.5, %v806_v48  ;;  %v2309_v29 = vmul.f32 %v823_v28, %v2196_v11 }
  0xdc   :  { %v2306_v33 = vadd.f32 %v1833_v2, %v548_v8  ;;  %v2312_v17 = vadd.f32 %v1833_v2, %v501_v31  ;;  %983 = vst.msk [vmem:[%s2961_s4 + $0x140] sm:$0xff] %vm942_vm1, %v2300_v19  ;;  %v775_v45 = vadd.f32 1.0, %v1480_v55 }
  0xdd   :  { %v2315_v22 = vadd.f32 %v1833_v2, %v517_v32  ;;  %v1482_v7 = vpop.eup %1481  ;;  %1115 = vrot.lane.b32.xlu1 %v2172_v5, %s1535_s0  ;;  %1147 = vrot.lane.b32.xlu2 %v2183_v54, %s1535_s0  ;;  %v664_v11 = vmul.f32 0.5, %v2303_v21  ;;  %v2329_v37 = vmul.f32 %v870_v15, %v2190_v26  ;;  %952 = vst.msk [vmem:[%s2961_s4 + $0x48] sm:$0xff] %vm942_vm1, %v2309_v29 }
  0xde   :  { %v680_v36 = vmul.f32 0.5, %v2306_v33  ;;  %v1484_v38 = vpop.eup %1483  ;;  %1179 = vrot.lane.b32.xlu0 %v2193_v27, %s1535_s0  ;;  %v633_v5 = vmul.f32 0.5, %v2312_v17  ;;  %v839_v43 = vmul.f32 0.5, %v775_v45  ;;  %v791_v23 = vadd.f32 1.0, %v1482_v7  ;;  %v2416_v7 = vld [vmem:[%s2959_s2] ss:$0 sm:$0xff] }
  0xdf   :  { %v649_v54 = vmul.f32 0.5, %v2315_v22  ;;  %v1486_v24 = vpop.eup %1485  ;;  %1489 = vtanh.f32 %v664_v11  ;;  %999 = vst.msk [vmem:[%s2961_s4 + $0x1c0] sm:$0xff] %vm942_vm1, %v2329_v37  ;;  %v807_v26 = vadd.f32 1.0, %v1484_v38  ;;  %v2426_v38 = vld [vmem:[%s2960_s3] ss:$0 sm:$0xff] }
  0xe0   :  { %v1488_v46 = vpop.eup %1487  ;;  %1491 = vtanh.f32 %v633_v5  ;;  %v423_v49 = vpop.f32.mrf.mxu2  ;;  %v2346_v27 = vmul.f32 %v839_v43, %v2204_v18  ;;  %v855_v51 = vmul.f32 0.5, %v791_v23  ;;  %v760_v52 = vadd.f32 1.0, %v1486_v24 }
  0xe1   :  { %v471_v25 = vpop.f32.mrf.mxu3  ;;  %1493 = vtanh.f32 %v649_v54  ;;  %v330_v44 = vpop.f32.mrf.mxu0  ;;  %v533_v12 = vmul.f32 %v1827_v1, %v423_v49  ;;  %v871_v41 = vmul.f32 0.5, %v807_v26  ;;  %v776_v53 = vadd.f32 1.0, %v1488_v46 }
  0xe2   :  { %v549_v59 = vmul.f32 %v1827_v1, %v471_v25  ;;  %v378_v34 = vpop.f32.mrf.mxu1  ;;  %1495 = vtanh.f32 %v680_v36  ;;  %v502_v63 = vmul.f32 %v1827_v1, %v330_v44  ;;  %968 = vst.msk [vmem:[%s2961_s4 + $0xc8] sm:$0xff] %vm942_vm1, %v2346_v27  ;;  %v2357_v18 = vmul.f32 %v855_v51, %v2245_v39 }
  0xe3   :  { %v518_v0 = vmul.f32 %v1827_v1, %v378_v34  ;;  %v2361_v50 = vadd.f32 %v1833_v2, %v533_v12  ;;  %v2367_v6 = vmul.f32 %v871_v41, %v2248_v57  ;;  %v824_v10 = vmul.f32 0.5, %v760_v52 }
  0xe4   :  { %v2364_v4 = vadd.f32 %v1833_v2, %v549_v59  ;;  %v2370_v9 = vadd.f32 %v1833_v2, %v502_v63  ;;  %984 = vst.msk [vmem:[%s2961_s4 + $0x148] sm:$0xff] %vm942_vm1, %v2357_v18 }
  0xe5   :  { %v2378_v39 = vadd.f32 %v1833_v2, %v518_v0  ;;  %v1490_v42 = vpop.eup %1489  ;;  %1117 = vrot.lane.b32.xlu2 %v2225_v35, %s1535_s0  ;;  %1085 = vrot.lane.b32.xlu1 %v2222_v30, %s1535_s0  ;;  %v665_v57 = vmul.f32 0.5, %v2361_v50  ;;  %1000 = vst.msk [vmem:[%s2961_s4 + $0x1c8] sm:$0xff] %vm942_vm1, %v2367_v6  ;;  %v840_v2 = vmul.f32 0.5, %v776_v53  ;;  %v2396_v30 = vmul.f32 %v824_v10, %v2251_v60 }
  0xe6   :  { %v681_v55 = vmul.f32 0.5, %v2364_v4  ;;  %v1492_v40 = vpop.eup %1491  ;;  %1149 = vrot.lane.b32.xlu0 %v2242_v56, %s1535_s0  ;;  %v634_v35 = vmul.f32 0.5, %v2370_v9  ;;  %v792_v13 = vadd.f32 1.0, %v1490_v42 }
  0xe7   :  { %v650_v47 = vmul.f32 0.5, %v2378_v39  ;;  %v1494_v48 = vpop.eup %1493  ;;  %1497 = vtanh.f32 %v665_v57  ;;  %v2399_v14 = vmul.f32 %v840_v2, %v2254_v61  ;;  %v761_v16 = vadd.f32 1.0, %v1492_v40  ;;  %953 = vst.msk [vmem:[%s2961_s4 + $0x50] sm:$0xff] %vm942_vm1, %v2396_v30 }
  0xe8   :  { %v1496_v20 = vpop.eup %1495  ;;  %1499 = vtanh.f32 %v634_v35  ;;  %v426_v8 = vpop.f32.mrf.mxu2  ;;  %v856_v56 = vmul.f32 0.5, %v792_v13  ;;  %v777_v60 = vadd.f32 1.0, %v1494_v48 }
  0xe9   :  { %v474_v28 = vpop.f32.mrf.mxu3  ;;  %1501 = vtanh.f32 %v681_v55  ;;  %v534_v31 = vmul.f32 %v1827_v1, %v426_v8  ;;  %969 = vst.msk [vmem:[%s2961_s4 + $0xd0] sm:$0xff] %vm942_vm1, %v2399_v14  ;;  %v333_v61 = vpop.f32.mrf.mxu0  ;;  %v808_v45 = vadd.f32 1.0, %v1496_v20  ;;  %v825_v23 = vmul.f32 0.5, %v761_v16 }
  0xea   :  { %v550_v32 = vmul.f32 %v1827_v1, %v474_v28  ;;  %v381_v15 = vpop.f32.mrf.mxu1  ;;  %1503 = vtanh.f32 %v650_v47  ;;  %v503_v11 = vmul.f32 %v2416_v7, %v333_v61  ;;  %v2421_v1 = vmul.f32 %v856_v56, %v2303_v21 }
  0xeb   :  { %v519_v36 = vmul.f32 %v2416_v7, %v381_v15  ;;  %v2429_v5 = vadd.f32 %v2426_v38, %v534_v31  ;;  %v872_v43 = vmul.f32 0.5, %v808_v45  ;;  %v841_v21 = vmul.f32 0.5, %v777_v60 }
  0xec   :  { %v2432_v54 = vadd.f32 %v2426_v38, %v550_v32  ;;  %v2435_v24 = vadd.f32 %v2426_v38, %v503_v11  ;;  %985 = vst.msk [vmem:[%s2961_s4 + $0x150] sm:$0xff] %vm942_vm1, %v2421_v1  ;;  %v2455_v52 = vmul.f32 %v825_v23, %v2312_v17 }
  0xed   :  { %v2438_v26 = vadd.f32 %v2426_v38, %v519_v36  ;;  %v1498_v46 = vpop.eup %1497  ;;  %1181 = vrot.lane.b32.xlu1 %v2268_v3, %s1535_s0  ;;  %1087 = vrot.lane.b32.xlu2 %v2271_v62, %s1535_s0  ;;  %v666_v49 = vmul.f32 0.5, %v2429_v5  ;;  %v2452_v51 = vmul.f32 %v872_v43, %v2306_v33  ;;  %v2462_v62 = vmul.f32 %v841_v21, %v2315_v22 }
  0xee   :  { %v682_v25 = vmul.f32 0.5, %v2432_v54  ;;  %v1500_v44 = vpop.eup %1499  ;;  %1119 = vrot.lane.b32.xlu0 %v2278_v58, %s1535_s0  ;;  %v635_v12 = vmul.f32 0.5, %v2435_v24  ;;  %v793_v59 = vadd.f32 1.0, %v1498_v46  ;;  %954 = vst.msk [vmem:[%s2961_s4 + $0x58] sm:$0xff] %vm942_vm1, %v2455_v52 }
  0xef   :  { %v651_v3 = vmul.f32 0.5, %v2438_v26  ;;  %v1502_v34 = vpop.eup %1501  ;;  %1505 = vtanh.f32 %v666_v49  ;;  %1001 = vst.msk [vmem:[%s2961_s4 + $0x1d0] sm:$0xff] %vm942_vm1, %v2452_v51  ;;  %v762_v33 = vadd.f32 1.0, %v1500_v44 }
  0xf0   :  { %v1504_v17 = vpop.eup %1503  ;;  %1507 = vtanh.f32 %v682_v25  ;;  %v429_v58 = vpop.f32.mrf.mxu2  ;;  %v857_v41 = vmul.f32 0.5, %v793_v59  ;;  %v809_v63 = vadd.f32 1.0, %v1502_v34  ;;  %970 = vst.msk [vmem:[%s2961_s4 + $0xd8] sm:$0xff] %vm942_vm1, %v2462_v62 }
  0xf1   :  { %v477_v22 = vpop.f32.mrf.mxu3  ;;  %1509 = vtanh.f32 %v635_v12  ;;  %v535_v0 = vmul.f32 %v2416_v7, %v429_v58  ;;  %v336_v53 = vpop.f32.mrf.mxu0  ;;  %v826_v57 = vmul.f32 0.5, %v762_v33 }
  0xf2   :  { %v384_v10 = vpop.f32.mrf.mxu1  ;;  %v551_v42 = vmul.f32 %v2416_v7, %v477_v22  ;;  %1511 = vtanh.f32 %v651_v3  ;;  %v504_v55 = vmul.f32 %v2416_v7, %v336_v53  ;;  %v2484_v40 = vmul.f32 %v857_v41, %v2361_v50 }
  0xf3   :  { %v520_v2 = vmul.f32 %v2416_v7, %v384_v10  ;;  %v2487_v35 = vadd.f32 %v2426_v38, %v535_v0  ;;  %v873_v13 = vmul.f32 0.5, %v809_v63  ;;  %v2493_v48 = vmul.f32 %v826_v57, %v2370_v9 }
  0xf4   :  { %v2490_v47 = vadd.f32 %v2426_v38, %v551_v42  ;;  %v2496_v16 = vadd.f32 %v2426_v38, %v504_v55  ;;  %986 = vst.msk [vmem:[%s2961_s4 + $0x158] sm:$0xff] %vm942_vm1, %v2484_v40  ;;  %v778_v50 = vadd.f32 1.0, %v1504_v17 }
  0xf5   :  { %v2499_v20 = vadd.f32 %v2426_v38, %v520_v2  ;;  %v1506_v8 = vpop.eup %1505  ;;  %1151 = vrot.lane.b32.xlu1 %v2300_v19, %s1535_s0  ;;  %1183 = vrot.lane.b32.xlu2 %v2329_v37, %s1535_s0  ;;  %v667_v9 = vmul.f32 0.5, %v2487_v35  ;;  %v2513_v56 = vmul.f32 %v873_v13, %v2364_v4  ;;  %955 = vst.msk [vmem:[%s2961_s4 + $0x60] sm:$0xff] %vm942_vm1, %v2493_v48 }
  0xf6   :  { %v683_v28 = vmul.f32 0.5, %v2490_v47  ;;  %v1508_v60 = vpop.eup %1507  ;;  %v1136_v31 = vpop.permute.xlu2 %1135  ;;  %1089 = vrot.lane.b32.xlu0 %v2309_v29, %s1535_s0  ;;  %v636_v19 = vmul.f32 0.5, %v2496_v16  ;;  %v842_v32 = vmul.f32 0.5, %v778_v50  ;;  %v794_v61 = vadd.f32 1.0, %v1506_v8 }
  0xf7   :  { %v652_v37 = vmul.f32 0.5, %v2499_v20  ;;  %v1510_v15 = vpop.eup %1509  ;;  %1295 = vst.msk [vmem:[%s2962_s5 + $0x100] sm:$0xff] %vm942_vm1, %v1136_v31  ;;  %1513 = vtanh.f32 %v667_v9  ;;  %v810_v4 = vadd.f32 1.0, %v1508_v60 }
  0xf8   :  { %v1512_v45 = vpop.eup %1511  ;;  %1515 = vtanh.f32 %v636_v19  ;;  %v432_v11 = vpop.f32.mrf.mxu2  ;;  %1002 = vst.msk [vmem:[%s2961_s4 + $0x1d8] sm:$0xff] %vm942_vm1, %v2513_v56  ;;  %v2534_v36 = vmul.f32 %v842_v32, %v2378_v39  ;;  %v858_v43 = vmul.f32 0.5, %v794_v61  ;;  %v763_v23 = vadd.f32 1.0, %v1510_v15 }
  0xf9   :  { %v480_v29 = vpop.f32.mrf.mxu3  ;;  %1517 = vtanh.f32 %v652_v37  ;;  %v536_v21 = vmul.f32 %v2416_v7, %v432_v11  ;;  %v339_v46 = vpop.f32.mrf.mxu0  ;;  %v874_v44 = vmul.f32 0.5, %v810_v4  ;;  %v779_v17 = vadd.f32 1.0, %v1512_v45 }
  0xfa   :  { %v387_v49 = vpop.f32.mrf.mxu1  ;;  %v552_v25 = vmul.f32 %v2416_v7, %v480_v29  ;;  %1519 = vtanh.f32 %v683_v28  ;;  %v505_v12 = vmul.f32 %v2416_v7, %v339_v46  ;;  %971 = vst.msk [vmem:[%s2961_s4 + $0xe0] sm:$0xff] %vm942_vm1, %v2534_v36  ;;  %v2546_v39 = vmul.f32 %v858_v43, %v2429_v5 }
  0xfb   :  { %v521_v3 = vmul.f32 %v2416_v7, %v387_v49  ;;  %v2549_v59 = vadd.f32 %v2426_v38, %v536_v21  ;;  %v2555_v33 = vmul.f32 %v874_v44, %v2432_v54  ;;  %v827_v5 = vmul.f32 0.5, %v763_v23 }
  0xfc   :  { %v2552_v34 = vadd.f32 %v2426_v38, %v552_v25  ;;  %v2558_v58 = vadd.f32 %v2426_v38, %v505_v12  ;;  %987 = vst.msk [vmem:[%s2961_s4 + $0x160] sm:$0xff] %vm942_vm1, %v2546_v39  ;;  %v843_v0 = vmul.f32 0.5, %v779_v17 }
  0xfd   :  { %v2561_v22 = vadd.f32 %v2426_v38, %v521_v3  ;;  %v1514_v41 = vpop.eup %1513  ;;  %1121 = vrot.lane.b32.xlu1 %v2346_v27, %s1535_s0  ;;  %1153 = vrot.lane.b32.xlu2 %v2357_v18, %s1535_s0  ;;  %v668_v54 = vmul.f32 0.5, %v2549_v59  ;;  %1003 = vst.msk [vmem:[%s2961_s4 + $0x1e0] sm:$0xff] %vm942_vm1, %v2555_v33  ;;  %v2584_v42 = vmul.f32 %v827_v5, %v2435_v24 }
  0xfe   :  { %v684_v63 = vmul.f32 0.5, %v2552_v34  ;;  %v1516_v53 = vpop.eup %1515  ;;  %v1106_v10 = vpop.permute.xlu2 %1105  ;;  %1185 = vrot.lane.b32.xlu0 %v2367_v6, %s1535_s0  ;;  %v637_v27 = vmul.f32 0.5, %v2558_v58  ;;  %v795_v57 = vadd.f32 1.0, %v1514_v41  ;;  %v2591_v2 = vmul.f32 %v843_v0, %v2438_v26 }
  0xff   :  { %v653_v18 = vmul.f32 0.5, %v2561_v22  ;;  %v1518_v55 = vpop.eup %1517  ;;  %1280 = vst.msk [vmem:[%s2962_s5 + $0x88] sm:$0xff] %vm942_vm1, %v1106_v10  ;;  %1521 = vtanh.f32 %v668_v54  ;;  %v764_v13 = vadd.f32 1.0, %v1516_v53 }
 0x100   :  { %v1520_v6 = vpop.eup %1519  ;;  %1523 = vtanh.f32 %v637_v27  ;;  %956 = vst.msk [vmem:[%s2961_s4 + $0x68] sm:$0xff] %vm942_vm1, %v2584_v42  ;;  %v859_v24 = vmul.f32 0.5, %v795_v57  ;;  %v780_v8 = vadd.f32 1.0, %v1518_v55  ;;  %v435_v28 = vpop.f32.mrf.mxu2 }
 0x101   :  { %v483_v50 = vpop.f32.mrf.mxu3  ;;  %1525 = vtanh.f32 %v653_v18  ;;  %972 = vst.msk [vmem:[%s2961_s4 + $0xe8] sm:$0xff] %vm942_vm1, %v2591_v2  ;;  %v828_v26 = vmul.f32 0.5, %v764_v13  ;;  %v811_v60 = vadd.f32 1.0, %v1520_v6  ;;  %v537_v31 = vmul.f32 %v2416_v7, %v435_v28 }
 0x102   :  { %v553_v9 = vmul.f32 %v2416_v7, %v483_v50  ;;  %1527 = vtanh.f32 %v684_v63  ;;  %v2606_v19 = vmul.f32 %v859_v24, %v2487_v35  ;;  %v844_v37 = vmul.f32 0.5, %v780_v8 }
 0x103   :  { %v2610_v61 = vmul.f32 %v828_v26, %v2496_v16  ;;  %v875_v15 = vmul.f32 0.5, %v811_v60  ;;  %v605_v4 = vadd.f32 %v2426_v38, %v537_v31 }
 0x104   :  { %v621_v32 = vadd.f32 %v2426_v38, %v553_v9  ;;  %988 = vst.msk [vmem:[%s2961_s4 + $0x168] sm:$0xff] %vm942_vm1, %v2606_v19  ;;  %v2619_v7 = vmul.f32 %v844_v37, %v2499_v20 }
 0x105   :  { %v1522_v35 = vpop.eup %1521  ;;  %1123 = vrot.lane.b32.xlu2 %v2399_v14, %s1535_s0  ;;  %1091 = vrot.lane.b32.xlu1 %v2396_v30, %s1535_s0  ;;  %957 = vst.msk [vmem:[%s2961_s4 + $0x70] sm:$0xff] %vm942_vm1, %v2610_v61  ;;  %v2631_v38 = vmul.f32 %v875_v15, %v2490_v47  ;;  %v669_v20 = vmul.f32 0.5, %v605_v4 }
 0x106   :  { %v685_v16 = vmul.f32 0.5, %v621_v32  ;;  %v1524_v45 = vpop.eup %1523  ;;  %1155 = vrot.lane.b32.xlu0 %v2421_v1, %s1535_s0  ;;  %v796_v11 = vadd.f32 1.0, %v1522_v35  ;;  %973 = vst.msk [vmem:[%s2961_s4 + $0xf0] sm:$0xff] %vm942_vm1, %v2619_v7 }
 0x107   :  { %v1526_v30 = vpop.eup %1525  ;;  %v1172_v14 = vpop.permute.xlu2 %1171  ;;  %v765_v43 = vadd.f32 1.0, %v1524_v45  ;;  %1004 = vst.msk [vmem:[%s2961_s4 + $0x1e8] sm:$0xff] %vm942_vm1, %v2631_v38 }
 0x108   :  { %v1072_v29 = vpop.permute.xlu0 %1071  ;;  %1529 = vtanh.f32 %v685_v16  ;;  %v1528_v1 = vpop.eup %1527  ;;  %1313 = vst.msk [vmem:[%s2962_s5 + $0x190] sm:$0xff] %vm942_vm1, %v1172_v14  ;;  %v860_v23 = vmul.f32 0.5, %v796_v11  ;;  %v781_v21 = vadd.f32 1.0, %v1526_v30 }
 0x109   :  { %v1104_v47 = vpop.permute.xlu1 %1103  ;;  %1531 = vtanh.f32 %v669_v20  ;;  %v829_v46 = vmul.f32 0.5, %v765_v43  ;;  %v812_v49 = vadd.f32 1.0, %v1528_v1  ;;  %1263 = vst.msk [vmem:[%s2962_s5] sm:$0xff] %vm942_vm1, %v1072_v29 }
 0x10a   :  { %1279 = vst.msk [vmem:[%s2962_s5 + $0x80] sm:$0xff] %vm942_vm1, %v1104_v47  ;;  %v924_v25 = vmul.f32 %v860_v23, %v2549_v59  ;;  %v845_v44 = vmul.f32 0.5, %v781_v21 }
 0x10b   :  { %v893_v12 = vmul.f32 %v829_v46, %v2558_v58  ;;  %v876_v3 = vmul.f32 0.5, %v812_v49 }
 0x10c   :  { %989 = vst.msk [vmem:[%s2961_s4 + $0x170] sm:$0xff] %vm942_vm1, %v924_v25  ;;  %v909_v17 = vmul.f32 %v845_v44, %v2561_v22 }
 0x10d   :  { %1187 = vrot.lane.b32.xlu1 %v2452_v51, %s1535_s0  ;;  %1093 = vrot.lane.b32.xlu2 %v2455_v52, %s1535_s0  ;;  %958 = vst.msk [vmem:[%s2961_s4 + $0x78] sm:$0xff] %vm942_vm1, %v893_v12  ;;  %v940_v59 = vmul.f32 %v876_v3, %v2552_v34 }
 0x10e   :  { %v1530_v5 = vpop.eup %1529  ;;  %1125 = vrot.lane.b32.xlu0 %v2462_v62, %s1535_s0  ;;  %974 = vst.msk [vmem:[%s2961_s4 + $0xf8] sm:$0xff] %vm942_vm1, %v909_v17 }
 0x10f   :  { %v1532_v58 = vpop.eup %1531  ;;  %v813_v51 = vadd.f32 1.0, %v1530_v5  ;;  %v1142_v22 = vpop.permute.xlu2 %1141  ;;  %1005 = vst.msk [vmem:[%s2961_s4 + $0x1f0] sm:$0xff] %vm942_vm1, %v940_v59 }
 0x110   :  { %v1168_v41 = vpop.permute.xlu0 %1167  ;;  %1298 = vst.msk [vmem:[%s2962_s5 + $0x118] sm:$0xff] %vm942_vm1, %v1142_v22  ;;  %v797_v62 = vadd.f32 1.0, %v1532_v58 }
 0x111   :  { %v877_v52 = vmul.f32 0.5, %v813_v51  ;;  %1311 = vst.msk [vmem:[%s2962_s5 + $0x180] sm:$0xff] %vm942_vm1, %v1168_v41 }
 0x112   :  { %v861_v54 = vmul.f32 0.5, %v797_v62 }
 0x113   :  { %v941_v34 = vmul.f32 %v877_v52, %v621_v32 }
 0x114   :  { %v925_v63 = vmul.f32 %v861_v54, %v605_v4 }
 0x115   :  { %1006 = vst.msk [vmem:[%s2961_s4 + $0x1f8] sm:$0xff] %vm942_vm1, %v941_v34  ;;  %1157 = vrot.lane.b32.xlu1 %v2484_v40, %s1535_s0  ;;  %1189 = vrot.lane.b32.xlu2 %v2513_v56, %s1535_s0 }
 0x116   :  { %1095 = vrot.lane.b32.xlu0 %v2493_v48, %s1535_s0  ;;  %990 = vst.msk [vmem:[%s2961_s4 + $0x178] sm:$0xff] %vm942_vm1, %v925_v63 }
 0x117   :  { %v1170_v0 = vpop.permute.xlu1 %1169  ;;  %v1080_v53 = vpop.permute.xlu2 %1079 }
 0x118   :  { %1312 = vst.msk [vmem:[%s2962_s5 + $0x188] sm:$0xff] %vm942_vm1, %v1170_v0  ;;  %v1074_v40 = vpop.permute.xlu0 %1073 }
 0x119   :  { %1267 = vst.msk [vmem:[%s2962_s5 + $0x20] sm:$0xff] %vm942_vm1, %v1080_v53 }
 0x11a   :  { %1264 = vst.msk [vmem:[%s2962_s5 + $0x8] sm:$0xff] %vm942_vm1, %v1074_v40 }
 0x11d   :  { %1127 = vrot.lane.b32.xlu1 %v2534_v36, %s1535_s0  ;;  %1159 = vrot.lane.b32.xlu2 %v2546_v39, %s1535_s0 }
 0x11e   :  { %1191 = vrot.lane.b32.xlu0 %v2555_v33, %s1535_s0 }
 0x11f   :  { %v1076_v48 = vpop.permute.xlu1 %1075  ;;  %v1112_v56 = vpop.permute.xlu2 %1111 }
 0x120   :  { %1265 = vst.msk [vmem:[%s2962_s5 + $0x10] sm:$0xff] %vm942_vm1, %v1076_v48  ;;  %v1138_v10 = vpop.permute.xlu0 %1137 }
 0x121   :  { %1283 = vst.msk [vmem:[%s2962_s5 + $0xa0] sm:$0xff] %vm942_vm1, %v1112_v56 }
 0x122   :  { %1296 = vst.msk [vmem:[%s2962_s5 + $0x108] sm:$0xff] %vm942_vm1, %v1138_v10 }
 0x125   :  { %1129 = vrot.lane.b32.xlu2 %v2591_v2, %s1535_s0  ;;  %1097 = vrot.lane.b32.xlu1 %v2584_v42, %s1535_s0 }
 0x126   :  { %1161 = vrot.lane.b32.xlu0 %v2606_v19, %s1535_s0 }
 0x127   :  { %v1140_v36 = vpop.permute.xlu1 %1139  ;;  %v1082_v39 = vpop.permute.xlu2 %1081 }
 0x128   :  { %1297 = vst.msk [vmem:[%s2962_s5 + $0x110] sm:$0xff] %vm942_vm1, %v1140_v36  ;;  %v1108_v33 = vpop.permute.xlu0 %1107 }
 0x129   :  { %1268 = vst.msk [vmem:[%s2962_s5 + $0x28] sm:$0xff] %vm942_vm1, %v1082_v39 }
 0x12a   :  { %1281 = vst.msk [vmem:[%s2962_s5 + $0x90] sm:$0xff] %vm942_vm1, %v1108_v33 }
 0x12d   :  { %1163 = vrot.lane.b32.xlu1 %v924_v25, %s1535_s0  ;;  %1099 = vrot.lane.b32.xlu2 %v2610_v61, %s1535_s0 }
 0x12e   :  { %1131 = vrot.lane.b32.xlu0 %v2619_v7, %s1535_s0 }
 0x12f   :  { %v1078_v27 = vpop.permute.xlu1 %1077  ;;  %v1178_v18 = vpop.permute.xlu2 %1177 }
 0x130   :  { %1266 = vst.msk [vmem:[%s2962_s5 + $0x18] sm:$0xff] %vm942_vm1, %v1078_v27  ;;  %v1174_v42 = vpop.permute.xlu0 %1173 }
 0x131   :  { %1316 = vst.msk [vmem:[%s2962_s5 + $0x1a8] sm:$0xff] %vm942_vm1, %v1178_v18 }
 0x132   :  { %1314 = vst.msk [vmem:[%s2962_s5 + $0x198] sm:$0xff] %vm942_vm1, %v1174_v42 }
 0x135   :  { %1133 = vrot.lane.b32.xlu1 %v909_v17, %s1535_s0  ;;  %1165 = vrot.lane.b32.xlu2 %v925_v63, %s1535_s0 }
 0x136   :  { %1101 = vrot.lane.b32.xlu0 %v893_v12, %s1535_s0 }
 0x137   :  { %v1110_v57 = vpop.permute.xlu1 %1109  ;;  %v1148_v55 = vpop.permute.xlu2 %1147 }
 0x138   :  { %1282 = vst.msk [vmem:[%s2962_s5 + $0x98] sm:$0xff] %vm942_vm1, %v1110_v57  ;;  %v1144_v2 = vpop.permute.xlu0 %1143 }
 0x139   :  { %1301 = vst.msk [vmem:[%s2962_s5 + $0x130] sm:$0xff] %vm942_vm1, %v1148_v55 }
 0x13a   :  { %1299 = vst.msk [vmem:[%s2962_s5 + $0x120] sm:$0xff] %vm942_vm1, %v1144_v2 }
 0x13d   :  { %1193 = vrot.lane.b32.xlu1 %v2631_v38, %s1535_s0  ;;  %1195 = vrot.lane.b32.xlu2 %v940_v59, %s1535_s0 }
 0x13e   :  { %1197 = vrot.lane.b32.xlu0 %v941_v34, %s1535_s0 }
 0x13f   :  { %v1176_v13 = vpop.permute.xlu1 %1175  ;;  %v1118_v6 = vpop.permute.xlu2 %1117 }
 0x140   :  { %1315 = vst.msk [vmem:[%s2962_s5 + $0x1a0] sm:$0xff] %vm942_vm1, %v1176_v13  ;;  %v1114_v50 = vpop.permute.xlu0 %1113 }
 0x141   :  { %1286 = vst.msk [vmem:[%s2962_s5 + $0xb8] sm:$0xff] %vm942_vm1, %v1118_v6 }
 0x142   :  { %1284 = vst.msk [vmem:[%s2962_s5 + $0xa8] sm:$0xff] %vm942_vm1, %v1114_v50 }
 0x147   :  { %v1146_v24 = vpop.permute.xlu1 %1145  ;;  %v1088_v8 = vpop.permute.xlu2 %1087 }
 0x148   :  { %1300 = vst.msk [vmem:[%s2962_s5 + $0x128] sm:$0xff] %vm942_vm1, %v1146_v24  ;;  %v1084_v9 = vpop.permute.xlu0 %1083 }
 0x149   :  { %1271 = vst.msk [vmem:[%s2962_s5 + $0x40] sm:$0xff] %vm942_vm1, %v1088_v8 }
 0x14a   :  { %1269 = vst.msk [vmem:[%s2962_s5 + $0x30] sm:$0xff] %vm942_vm1, %v1084_v9 }
 0x14f   :  { %v1116_v28 = vpop.permute.xlu1 %1115  ;;  %v1184_v26 = vpop.permute.xlu2 %1183 }
 0x150   :  { %1285 = vst.msk [vmem:[%s2962_s5 + $0xb0] sm:$0xff] %vm942_vm1, %v1116_v28  ;;  %v1180_v60 = vpop.permute.xlu0 %1179 }
 0x151   :  { %1319 = vst.msk [vmem:[%s2962_s5 + $0x1c0] sm:$0xff] %vm942_vm1, %v1184_v26 }
 0x152   :  { %1317 = vst.msk [vmem:[%s2962_s5 + $0x1b0] sm:$0xff] %vm942_vm1, %v1180_v60 }
 0x157   :  { %v1086_v31 = vpop.permute.xlu1 %1085  ;;  %v1154_v19 = vpop.permute.xlu2 %1153 }
 0x158   :  { %1270 = vst.msk [vmem:[%s2962_s5 + $0x38] sm:$0xff] %vm942_vm1, %v1086_v31  ;;  %v1150_v37 = vpop.permute.xlu0 %1149 }
 0x159   :  { %1304 = vst.msk [vmem:[%s2962_s5 + $0x148] sm:$0xff] %vm942_vm1, %v1154_v19 }
 0x15a   :  { %1302 = vst.msk [vmem:[%s2962_s5 + $0x138] sm:$0xff] %vm942_vm1, %v1150_v37 }
 0x15f   :  { %v1182_v32 = vpop.permute.xlu1 %1181  ;;  %v1124_v61 = vpop.permute.xlu2 %1123 }
 0x160   :  { %1318 = vst.msk [vmem:[%s2962_s5 + $0x1b8] sm:$0xff] %vm942_vm1, %v1182_v32  ;;  %v1120_v15 = vpop.permute.xlu0 %1119 }
 0x161   :  { %1289 = vst.msk [vmem:[%s2962_s5 + $0xd0] sm:$0xff] %vm942_vm1, %v1124_v61 }
 0x162   :  { %1287 = vst.msk [vmem:[%s2962_s5 + $0xc0] sm:$0xff] %vm942_vm1, %v1120_v15 }
 0x167   :  { %v1152_v4 = vpop.permute.xlu1 %1151  ;;  %v1094_v7 = vpop.permute.xlu2 %1093 }
 0x168   :  { %1303 = vst.msk [vmem:[%s2962_s5 + $0x140] sm:$0xff] %vm942_vm1, %v1152_v4  ;;  %v1090_v35 = vpop.permute.xlu0 %1089 }
 0x169   :  { %1274 = vst.msk [vmem:[%s2962_s5 + $0x58] sm:$0xff] %vm942_vm1, %v1094_v7 }
 0x16a   :  { %1272 = vst.msk [vmem:[%s2962_s5 + $0x48] sm:$0xff] %vm942_vm1, %v1090_v35 }
 0x16f   :  { %v1122_v16 = vpop.permute.xlu1 %1121  ;;  %v1190_v38 = vpop.permute.xlu2 %1189 }
 0x170   :  { %1288 = vst.msk [vmem:[%s2962_s5 + $0xc8] sm:$0xff] %vm942_vm1, %v1122_v16  ;;  %v1186_v45 = vpop.permute.xlu0 %1185 }
 0x171   :  { %1322 = vst.msk [vmem:[%s2962_s5 + $0x1d8] sm:$0xff] %vm942_vm1, %v1190_v38 }
 0x172   :  { %1320 = vst.msk [vmem:[%s2962_s5 + $0x1c8] sm:$0xff] %vm942_vm1, %v1186_v45 }
 0x177   :  { %v1092_v20 = vpop.permute.xlu1 %1091  ;;  %v1160_v11 = vpop.permute.xlu2 %1159 }
 0x178   :  { %1273 = vst.msk [vmem:[%s2962_s5 + $0x50] sm:$0xff] %vm942_vm1, %v1092_v20  ;;  %v1156_v30 = vpop.permute.xlu0 %1155 }
 0x179   :  { %1307 = vst.msk [vmem:[%s2962_s5 + $0x160] sm:$0xff] %vm942_vm1, %v1160_v11 }
 0x17a   :  { %1305 = vst.msk [vmem:[%s2962_s5 + $0x150] sm:$0xff] %vm942_vm1, %v1156_v30 }
 0x17f   :  { %v1188_v14 = vpop.permute.xlu1 %1187  ;;  %v1130_v29 = vpop.permute.xlu2 %1129 }
 0x180   :  { %1321 = vst.msk [vmem:[%s2962_s5 + $0x1d0] sm:$0xff] %vm942_vm1, %v1188_v14  ;;  %v1126_v43 = vpop.permute.xlu0 %1125 }
 0x181   :  { %1292 = vst.msk [vmem:[%s2962_s5 + $0xe8] sm:$0xff] %vm942_vm1, %v1130_v29 }
 0x182   :  { %1290 = vst.msk [vmem:[%s2962_s5 + $0xd8] sm:$0xff] %vm942_vm1, %v1126_v43 }
 0x187   :  { %v1158_v1 = vpop.permute.xlu1 %1157  ;;  %v1100_v47 = vpop.permute.xlu2 %1099 }
 0x188   :  { %1306 = vst.msk [vmem:[%s2962_s5 + $0x158] sm:$0xff] %vm942_vm1, %v1158_v1  ;;  %v1096_v23 = vpop.permute.xlu0 %1095 }
 0x189   :  { %1277 = vst.msk [vmem:[%s2962_s5 + $0x70] sm:$0xff] %vm942_vm1, %v1100_v47 }
 0x18a   :  { %1275 = vst.msk [vmem:[%s2962_s5 + $0x60] sm:$0xff] %vm942_vm1, %v1096_v23 }
 0x18f   :  { %v1128_v21 = vpop.permute.xlu1 %1127  ;;  %v1166_v46 = vpop.permute.xlu2 %1165 }
 0x190   :  { %1291 = vst.msk [vmem:[%s2962_s5 + $0xe0] sm:$0xff] %vm942_vm1, %v1128_v21  ;;  %v1192_v49 = vpop.permute.xlu0 %1191 }
 0x191   :  { %1310 = vst.msk [vmem:[%s2962_s5 + $0x178] sm:$0xff] %vm942_vm1, %v1166_v46 }
 0x192   :  { %1323 = vst.msk [vmem:[%s2962_s5 + $0x1e0] sm:$0xff] %vm942_vm1, %v1192_v49 }
 0x197   :  { %v1098_v25 = vpop.permute.xlu1 %1097  ;;  %v1196_v44 = vpop.permute.xlu2 %1195 }
 0x198   :  { %1276 = vst.msk [vmem:[%s2962_s5 + $0x68] sm:$0xff] %vm942_vm1, %v1098_v25  ;;  %v1162_v12 = vpop.permute.xlu0 %1161 }
 0x199   :  { %1325 = vst.msk [vmem:[%s2962_s5 + $0x1f0] sm:$0xff] %vm942_vm1, %v1196_v44 }
 0x19a   :  { %1308 = vst.msk [vmem:[%s2962_s5 + $0x168] sm:$0xff] %vm942_vm1, %v1162_v12 }
 0x19f   :  { %v1164_v3 = vpop.permute.xlu1 %1163 }
 0x1a0   :  { %1309 = vst.msk [vmem:[%s2962_s5 + $0x170] sm:$0xff] %vm942_vm1, %v1164_v3  ;;  %v1132_v17 = vpop.permute.xlu0 %1131 }
 0x1a1   :  { %1293 = vst.msk [vmem:[%s2962_s5 + $0xf0] sm:$0xff] %vm942_vm1, %v1132_v17 }
 0x1a7   :  { %v1134_v5 = vpop.permute.xlu1 %1133 }
 0x1a8   :  { %1294 = vst.msk [vmem:[%s2962_s5 + $0xf8] sm:$0xff] %vm942_vm1, %v1134_v5  ;;  %v1102_v59 = vpop.permute.xlu0 %1101 }
 0x1a9   :  { %1278 = vst.msk [vmem:[%s2962_s5 + $0x78] sm:$0xff] %vm942_vm1, %v1102_v59 }
 0x1af   :  { %v1194_v58 = vpop.permute.xlu1 %1193 }
 0x1b0   :  { %1324 = vst.msk [vmem:[%s2962_s5 + $0x1e8] sm:$0xff] %vm942_vm1, %v1194_v58  ;;  %v1198_v51 = vpop.permute.xlu0 %1197 }
 0x1b1   :  { %1326 = vst.msk [vmem:[%s2962_s5 + $0x1f8] sm:$0xff] %vm942_vm1, %v1198_v51 }

</bundles_post_ra>
